<compile_context>
chip_gen: v7x
topology: tpu7x:2x2x1
jax: 0.10.0
libtpu: 0.0.40
codegen_flags: <defaults>
</compile_context>

<pallas_src>
import functools

import jax
import jax.numpy as jnp
from jax import lax
from jax.experimental import pallas as pl
from jax.experimental.pallas import tpu as pltpu

MAX_PAD = 6                 # largest dilation padding among the branches
DILATIONS = (1, 2, 4, 6)    # dilations of the 3x3 branches
BN_EPS = 1e-5               # PyTorch BatchNorm2d default eps


def _tap_geometry(W):
  """Static lane offsets of the 33 deduplicated taps in the flat padded image."""
  P = MAX_PAD
  Wp = W + 2 * P
  offsets = [P * Wp + P]                      # tap 0: shared center tap
  for d in DILATIONS:
    for ky in range(3):
      for kx in range(3):
        if ky == 1 and kx == 1:
          continue
        offsets.append((P + (ky - 1) * d) * Wp + (P + (kx - 1) * d))
  return tuple(offsets)                       # 1 + 4*8 = 33 offsets


def _bwag_kernel(offsets, n_lanes, H, W, Wp, HWo,
                 xflat_ref, xlane_ref, w_ref, b_ref, wout_ref,
                 out_ref, wgt_ref):
  """One batch element per grid step; channels on sublanes, flat rows on lanes.

  xflat_ref: (1, Cin, FLAT)   bf16 zero-padded image, padded rows flattened
  xlane_ref: (1, Cin, HWo)    f32 unpadded image, lane-dense (HWo = HW rounded to 128)
  w_ref    : (33, Mpad, Cin)  bf16 folded conv+BN weights, one block per tap
  b_ref    : (Mpad, 1)        f32 folded BN biases   (zeros in padded rows)
  wout_ref : (Mpad, 1)        f32 conv_out weights   (zeros in padded rows)
  out_ref  : (1, Cin, HWo)    f32 gated feature  (lane-dense)
  wgt_ref  : (1, 1, HWo)      f32 attention weight (lane-dense)
  """
  m_pad = w_ref.shape[1]

  # All five branches (1x1 conv + four dilated 3x3) as 33 deduplicated taps:
  # one small MXU matmul per tap, accumulated in f32.  No im2col copy/concat.
  acc = jnp.zeros((m_pad, n_lanes), jnp.float32)
  for t, off in enumerate(offsets):
    x_t = xflat_ref[0, :, off:off + n_lanes]              # (Cin, n_lanes) bf16
    acc = acc + jnp.dot(w_ref[t], x_t, preferred_element_type=jnp.float32)

  # Folded BN bias + ReLU in one VPU pass (broadcast happens once per step).
  act = jnp.maximum(acc + b_ref[...], 0.0)                 # (Mpad, n_lanes) f32

  # conv_out (1 output channel): for small hidden widths a VPU multiply +
  # XLU sublane reduction beats a serialized M=1 MXU push/drain.
  if m_pad <= 32:
    logit = jnp.sum(act * wout_ref[...], axis=0, keepdims=True)   # (1, n_lanes)
  else:
    logit = jnp.dot(wout_ref[...].T, act, preferred_element_type=jnp.float32)

  # Compact Wp-wide rows -> W-wide rows (drop halo columns); single sublane row.
  rows = [logit[:, r * Wp: r * Wp + W] for r in range(H)]
  if HWo > H * W:
    rows.append(jnp.zeros((1, HWo - H * W), jnp.float32))
  logit_c = jnp.concatenate(rows, axis=1)                  # (1, HWo) lane-dense

  # Sigmoid on the EUP; the clamp keeps exp finite so approx reciprocal is safe.
  z = jnp.clip(logit_c, -30.0, 30.0)
  wgt = pl.reciprocal(1.0 + jnp.exp(-z), approx=True)      # (1, HWo)

  wgt_ref[0] = wgt
  out_ref[0] = xlane_ref[0] * (1.0 + wgt)                  # x * weight + x


@jax.jit
def bwag_atrous_2d(x, wtaps, bias, wout_col):
  """x: (B, Cin, H, W) NCHW f32. Returns (feature, weight) in NCHW."""
  B, Cin, H, W = x.shape
  n_taps, m_pad, _ = wtaps.shape
  P = MAX_PAD
  Hp, Wp = H + 2 * P, W + 2 * P
  HW = H * W
  HWo = ((HW + 127) // 128) * 128            # lane-dense (unmasked) output stores
  n_lanes = H * Wp                           # per-image compute lane width
  flat = (Hp + 1) * Wp                       # +1 zero row keeps all tap slices in-bounds

  # bf16 MXU operand: zero-padded spatially (halo P + one extra bottom row),
  # rows flattened.  No NCHW<->NHWC transposes anywhere.
  xpad = jnp.pad(x.astype(jnp.bfloat16), ((0, 0), (0, 0), (P, P + 1), (P, P)))
  xflat = xpad.reshape(B, Cin, flat)
  # f32 lane-dense unpadded image for the elementwise gating (no MXU rebuild of x).
  x_lane = x.reshape(B, Cin, HW).astype(jnp.float32)
  if HWo > HW:
    x_lane = jnp.pad(x_lane, ((0, 0), (0, 0), (0, HWo - HW)))

  kernel = functools.partial(_bwag_kernel, _tap_geometry(W), n_lanes, H, W, Wp, HWo)
  invariant = pl.Buffered(1)                 # grid-invariant operands: single-buffer

  grid_spec = pltpu.PrefetchScalarGridSpec(
      num_scalar_prefetch=0,
      grid=(B,),
      in_specs=[
          pl.BlockSpec((1, Cin, flat), lambda b: (b, 0, 0)),
          pl.BlockSpec((1, Cin, HWo), lambda b: (b, 0, 0)),
          pl.BlockSpec((n_taps, m_pad, Cin), lambda b: (0, 0, 0),
                       pipeline_mode=invariant),
          pl.BlockSpec((m_pad, 1), lambda b: (0, 0), pipeline_mode=invariant),
          pl.BlockSpec((m_pad, 1), lambda b: (0, 0), pipeline_mode=invariant),
      ],
      out_specs=[
          pl.BlockSpec((1, Cin, HWo), lambda b: (b, 0, 0)),
          pl.BlockSpec((1, 1, HWo), lambda b: (b, 0, 0)),
      ],
  )

  # Per-step working set is ~0.2 MiB even double-buffered — far below the
  # scoped-VMEM defaults on v5e/v6e/v7x, so the VMEM limit is left at default.
  out_flat, wgt_flat = pl.pallas_call(
      kernel,
      out_shape=(
          jax.ShapeDtypeStruct((B, Cin, HWo), jnp.float32),
          jax.ShapeDtypeStruct((B, 1, HWo), jnp.float32),
      ),
      grid_spec=grid_spec,
      compiler_params=pltpu.CompilerParams(
          dimension_semantics=("parallel",),   # B >= 2 feeds both v7x TensorCores
      ),
  )(xflat, x_lane, wtaps, bias, wout_col)

  # TODO(synk): for B == 1 or very large H*W, add spatial row-tiling with a
  # MAX_PAD halo (manual DMA / Element-offset specs) so both v7x TensorCores
  # are fed and the per-step VMEM footprint stays bounded.
  out = out_flat[..., :HW].reshape(B, Cin, H, W)
  wgt = wgt_flat[..., :HW].reshape(B, 1, H, W)
  return out, wgt


# ----------------------------- parameter setup ------------------------------

def make_params(key, in_channels, hidden_channels=None):
  """Deterministic synthetic parameters (PyTorch-shaped raw params)."""
  if hidden_channels is None:
    hidden_channels = in_channels // 2
  Cin, Ch = in_channels, hidden_channels
  keys = jax.random.split(key, 32)
  raw = {}
  raw['w1'] = 0.3 * jax.random.normal(keys[0], (Ch, Cin), jnp.float32)
  raw['w3'] = [0.2 * jax.random.normal(keys[1 + i], (Ch, Cin, 3, 3), jnp.float32)
               for i in range(len(DILATIONS))]
  raw['bn'] = []
  for i in range(5):
    gamma = 1.0 + 0.1 * jax.random.normal(keys[6 + i], (Ch,), jnp.float32)
    beta = 0.1 * jax.random.normal(keys[11 + i], (Ch,), jnp.float32)
    mean = 0.05 * jax.random.normal(keys[16 + i], (Ch,), jnp.float32)
    var = 0.8 + 0.2 * jnp.abs(jax.random.normal(keys[21 + i], (Ch,), jnp.float32))
    raw['bn'].append((gamma, beta, mean, var))
  raw['wout'] = 0.3 * jax.random.normal(keys[26], (1, 5 * Ch), jnp.float32)
  return raw


def fold_params(raw):
  """Fold eval-mode BatchNorm into the convs; pack per-tap weight blocks.

  Returns:
    wtaps    : (33, Mpad, Cin) bf16 — tap 0 is the shared center tap (the 1x1
               conv plus every dilated branch's (1,1) tap); taps 1..32 are the
               8 non-center taps of each dilation in (ky, kx) row-major order.
               Mpad = 5*Ch rounded up to a multiple of 8 (zero padded rows).
    bias     : (Mpad, 1) f32 folded BN biases   (zeros in padded rows).
    wout_col : (Mpad, 1) f32 conv_out weights   (zeros in padded rows).
  """
  Ch, Cin = raw['w1'].shape
  M = 5 * Ch
  Mpad = ((M + 7) // 8) * 8                  # sublane-align the fused M dim

  def fold(gamma, beta, mean, var):
    s = gamma / jnp.sqrt(var + BN_EPS)
    return s, beta - mean * s

  scales, biases = zip(*(fold(*bn) for bn in raw['bn']))

  n_taps = 1 + 8 * len(DILATIONS)            # 33
  wtaps = jnp.zeros((n_taps, Mpad, Cin), jnp.float32)
  wtaps = wtaps.at[0, 0:Ch, :].set(raw['w1'] * scales[0][:, None])   # 1x1 branch
  for bi in range(len(DILATIONS)):
    wf = raw['w3'][bi] * scales[bi + 1][:, None, None, None]         # (Ch,Cin,3,3)
    r0 = (bi + 1) * Ch
    wtaps = wtaps.at[0, r0:r0 + Ch, :].set(wf[:, :, 1, 1])           # shared center
    j = 0
    for ky in range(3):
      for kx in range(3):
        if ky == 1 and kx == 1:
          continue
        wtaps = wtaps.at[1 + bi * 8 + j, r0:r0 + Ch, :].set(wf[:, :, ky, kx])
        j += 1

  bias = jnp.zeros((Mpad, 1), jnp.float32).at[0:M, 0].set(jnp.concatenate(biases))
  wout_col = jnp.zeros((Mpad, 1), jnp.float32).at[0:M, 0].set(raw['wout'].reshape(-1))
  # bf16 MXU operands (f32 accumulation is requested in the kernel).
  return wtaps.astype(jnp.bfloat16), bias, wout_col


# ------------------------------ pure-JAX reference ---------------------------

def reference(x_nchw, raw):
  def bn_relu(y, gamma, beta, mean, var):
    y = (y - mean[None, :, None, None]) / jnp.sqrt(var + BN_EPS)[None, :, None, None]
    return jnp.maximum(y * gamma[None, :, None, None] + beta[None, :, None, None], 0.0)

  dn = ('NCHW', 'OIHW', 'NCHW')
  outs = []
  y = lax.conv_general_dilated(x_nchw, raw['w1'][..., None, None], (1, 1),
                               'VALID', dimension_numbers=dn)
  outs.append(bn_relu(y, *raw['bn'][0]))
  for i, d in enumerate(DILATIONS):
    y = lax.conv_general_dilated(x_nchw, raw['w3'][i], (1, 1),
                                 [(d, d), (d, d)], rhs_dilation=(d, d),
                                 dimension_numbers=dn)
    outs.append(bn_relu(y, *raw['bn'][i + 1]))
  res = jnp.concatenate(outs, axis=1)
  logit = lax.conv_general_dilated(res, raw['wout'][..., None, None], (1, 1),
                                   'VALID', dimension_numbers=dn)
  wgt = jax.nn.sigmoid(logit)
  return x_nchw * wgt + x_nchw, wgt


# ----------------------------------- main ------------------------------------

if __name__ == "__main__":
  B, Cin, H, W = 2, 4, 16, 16
  key = jax.random.PRNGKey(0)
  kx_, kp = jax.random.split(key)

  x = jax.random.normal(kx_, (B, Cin, H, W), jnp.float32)
  raw = make_params(kp, Cin)
  wtaps, bias, wout_col = fold_params(raw)

  out, wgt = bwag_atrous_2d(x, wtaps, bias, wout_col)
  out, wgt = jax.block_until_ready((out, wgt))

  out_ref, wgt_ref = reference(x, raw)
  assert out.shape == (B, Cin, H, W) and wgt.shape == (B, 1, H, W)
  # Tolerance relaxed for bf16 MXU operands (f32 accumulation) + EUP approx
  # reciprocal in the sigmoid; the f32 reference is exact.
  assert jnp.allclose(out, out_ref, atol=2e-2, rtol=2e-2)
  assert jnp.allclose(wgt, wgt_ref, atol=2e-2, rtol=2e-2)

  print("KERNEL_OK")
</pallas_src>

<mosaic_0001>
module attributes {stable_mosaic.version = 11 : i64} {
  func.func @_bwag_kernel(%arg0: i32, %arg1: memref<1x4x812xbf16, #tpu.memory_space<vmem>>, %arg2: memref<1x4x256xf32, #tpu.memory_space<vmem>>, %arg3: memref<33x16x4xbf16, #tpu.memory_space<vmem>>, %arg4: memref<16x1xf32, #tpu.memory_space<vmem>>, %arg5: memref<16x1xf32, #tpu.memory_space<vmem>>, %arg6: memref<1x4x256xf32, #tpu.memory_space<vmem>>, %arg7: memref<1x1x256xf32, #tpu.memory_space<vmem>>) attributes {dimension_semantics = [#tpu.dimension_semantics<parallel>], iteration_bounds = array<i64: 2>, scalar_prefetch = 0 : i64, scratch_operands = 0 : i64, tpu.core_type = #tpu.core_type<tc>, window_params = [{transform_indices = @transform_0, window_bounds = array<i64: 1, 4, 812>}, {transform_indices = @transform_1, window_bounds = array<i64: 1, 4, 256>}, {pipeline_mode = #tpu.pipeline_mode<synchronous>, transform_indices = @transform_2, window_bounds = array<i64: 33, 16, 4>}, {pipeline_mode = #tpu.pipeline_mode<synchronous>, transform_indices = @transform_3, window_bounds = array<i64: 16, 1>}, {pipeline_mode = #tpu.pipeline_mode<synchronous>, transform_indices = @transform_4, window_bounds = array<i64: 16, 1>}, {transform_indices = @transform_5, window_bounds = array<i64: 1, 4, 256>}, {transform_indices = @transform_6, window_bounds = array<i64: 1, 1, 256>}]} {
    %cst = arith.constant 0.000000e+00 : f32
    %0 = vector.broadcast %cst : f32 to vector<16x448xf32>
    %c0 = arith.constant 0 : index
    %c0_0 = arith.constant 0 : index
    %c174 = arith.constant 174 : index
    %1 = vector.load %arg1[%c0, %c0_0, %c174] : memref<1x4x812xbf16, #tpu.memory_space<vmem>>, vector<1x4x448xbf16>
    %2 = vector.shape_cast %1 : vector<1x4x448xbf16> to vector<4x448xbf16>
    %c0_1 = arith.constant 0 : index
    %c0_2 = arith.constant 0 : index
    %c0_3 = arith.constant 0 : index
    %3 = vector.load %arg3[%c0_1, %c0_2, %c0_3] : memref<33x16x4xbf16, #tpu.memory_space<vmem>>, vector<1x16x4xbf16>
    %4 = vector.shape_cast %3 : vector<1x16x4xbf16> to vector<16x4xbf16>
    %cst_4 = arith.constant dense<0.000000e+00> : vector<16x448xf32>
    %5 = tpu.matmul %4, %2, %cst_4 {dimension_numbers = #tpu.dot_dimension_numbers<[1], [0], [0], [1], [0, 0, 1, 1], [], []>} : vector<16x4xbf16>, vector<4x448xbf16>, vector<16x448xf32> -> vector<16x448xf32>
    %6 = arith.addf %0, %5 : vector<16x448xf32>
    %c0_5 = arith.constant 0 : index
    %c0_6 = arith.constant 0 : index
    %c145 = arith.constant 145 : index
    %7 = vector.load %arg1[%c0_5, %c0_6, %c145] : memref<1x4x812xbf16, #tpu.memory_space<vmem>>, vector<1x4x448xbf16>
    %8 = vector.shape_cast %7 : vector<1x4x448xbf16> to vector<4x448xbf16>
    %c1 = arith.constant 1 : index
    %c0_7 = arith.constant 0 : index
    %c0_8 = arith.constant 0 : index
    %9 = vector.load %arg3[%c1, %c0_7, %c0_8] : memref<33x16x4xbf16, #tpu.memory_space<vmem>>, vector<1x16x4xbf16>
    %10 = vector.shape_cast %9 : vector<1x16x4xbf16> to vector<16x4xbf16>
    %cst_9 = arith.constant dense<0.000000e+00> : vector<16x448xf32>
    %11 = tpu.matmul %10, %8, %cst_9 {dimension_numbers = #tpu.dot_dimension_numbers<[1], [0], [0], [1], [0, 0, 1, 1], [], []>} : vector<16x4xbf16>, vector<4x448xbf16>, vector<16x448xf32> -> vector<16x448xf32>
    %12 = arith.addf %6, %11 : vector<16x448xf32>
    %c0_10 = arith.constant 0 : index
    %c0_11 = arith.constant 0 : index
    %c146 = arith.constant 146 : index
    %13 = vector.load %arg1[%c0_10, %c0_11, %c146] : memref<1x4x812xbf16, #tpu.memory_space<vmem>>, vector<1x4x448xbf16>
    %14 = vector.shape_cast %13 : vector<1x4x448xbf16> to vector<4x448xbf16>
    %c2 = arith.constant 2 : index
    %c0_12 = arith.constant 0 : index
    %c0_13 = arith.constant 0 : index
    %15 = vector.load %arg3[%c2, %c0_12, %c0_13] : memref<33x16x4xbf16, #tpu.memory_space<vmem>>, vector<1x16x4xbf16>
    %16 = vector.shape_cast %15 : vector<1x16x4xbf16> to vector<16x4xbf16>
    %cst_14 = arith.constant dense<0.000000e+00> : vector<16x448xf32>
    %17 = tpu.matmul %16, %14, %cst_14 {dimension_numbers = #tpu.dot_dimension_numbers<[1], [0], [0], [1], [0, 0, 1, 1], [], []>} : vector<16x4xbf16>, vector<4x448xbf16>, vector<16x448xf32> -> vector<16x448xf32>
    %18 = arith.addf %12, %17 : vector<16x448xf32>
    %c0_15 = arith.constant 0 : index
    %c0_16 = arith.constant 0 : index
    %c147 = arith.constant 147 : index
    %19 = vector.load %arg1[%c0_15, %c0_16, %c147] : memref<1x4x812xbf16, #tpu.memory_space<vmem>>, vector<1x4x448xbf16>
    %20 = vector.shape_cast %19 : vector<1x4x448xbf16> to vector<4x448xbf16>
    %c3 = arith.constant 3 : index
    %c0_17 = arith.constant 0 : index
    %c0_18 = arith.constant 0 : index
    %21 = vector.load %arg3[%c3, %c0_17, %c0_18] : memref<33x16x4xbf16, #tpu.memory_space<vmem>>, vector<1x16x4xbf16>
    %22 = vector.shape_cast %21 : vector<1x16x4xbf16> to vector<16x4xbf16>
    %cst_19 = arith.constant dense<0.000000e+00> : vector<16x448xf32>
    %23 = tpu.matmul %22, %20, %cst_19 {dimension_numbers = #tpu.dot_dimension_numbers<[1], [0], [0], [1], [0, 0, 1, 1], [], []>} : vector<16x4xbf16>, vector<4x448xbf16>, vector<16x448xf32> -> vector<16x448xf32>
    %24 = arith.addf %18, %23 : vector<16x448xf32>
    %c0_20 = arith.constant 0 : index
    %c0_21 = arith.constant 0 : index
    %c173 = arith.constant 173 : index
    %25 = vector.load %arg1[%c0_20, %c0_21, %c173] : memref<1x4x812xbf16, #tpu.memory_space<vmem>>, vector<1x4x448xbf16>
    %26 = vector.shape_cast %25 : vector<1x4x448xbf16> to vector<4x448xbf16>
    %c4 = arith.constant 4 : index
    %c0_22 = arith.constant 0 : index
    %c0_23 = arith.constant 0 : index
    %27 = vector.load %arg3[%c4, %c0_22, %c0_23] : memref<33x16x4xbf16, #tpu.memory_space<vmem>>, vector<1x16x4xbf16>
    %28 = vector.shape_cast %27 : vector<1x16x4xbf16> to vector<16x4xbf16>
    %cst_24 = arith.constant dense<0.000000e+00> : vector<16x448xf32>
    %29 = tpu.matmul %28, %26, %cst_24 {dimension_numbers = #tpu.dot_dimension_numbers<[1], [0], [0], [1], [0, 0, 1, 1], [], []>} : vector<16x4xbf16>, vector<4x448xbf16>, vector<16x448xf32> -> vector<16x448xf32>
    %30 = arith.addf %24, %29 : vector<16x448xf32>
    %c0_25 = arith.constant 0 : index
    %c0_26 = arith.constant 0 : index
    %c175 = arith.constant 175 : index
    %31 = vector.load %arg1[%c0_25, %c0_26, %c175] : memref<1x4x812xbf16, #tpu.memory_space<vmem>>, vector<1x4x448xbf16>
    %32 = vector.shape_cast %31 : vector<1x4x448xbf16> to vector<4x448xbf16>
    %c5 = arith.constant 5 : index
    %c0_27 = arith.constant 0 : index
    %c0_28 = arith.constant 0 : index
    %33 = vector.load %arg3[%c5, %c0_27, %c0_28] : memref<33x16x4xbf16, #tpu.memory_space<vmem>>, vector<1x16x4xbf16>
    %34 = vector.shape_cast %33 : vector<1x16x4xbf16> to vector<16x4xbf16>
    %cst_29 = arith.constant dense<0.000000e+00> : vector<16x448xf32>
    %35 = tpu.matmul %34, %32, %cst_29 {dimension_numbers = #tpu.dot_dimension_numbers<[1], [0], [0], [1], [0, 0, 1, 1], [], []>} : vector<16x4xbf16>, vector<4x448xbf16>, vector<16x448xf32> -> vector<16x448xf32>
    %36 = arith.addf %30, %35 : vector<16x448xf32>
    %c0_30 = arith.constant 0 : index
    %c0_31 = arith.constant 0 : index
    %c201 = arith.constant 201 : index
    %37 = vector.load %arg1[%c0_30, %c0_31, %c201] : memref<1x4x812xbf16, #tpu.memory_space<vmem>>, vector<1x4x448xbf16>
    %38 = vector.shape_cast %37 : vector<1x4x448xbf16> to vector<4x448xbf16>
    %c6 = arith.constant 6 : index
    %c0_32 = arith.constant 0 : index
    %c0_33 = arith.constant 0 : index
    %39 = vector.load %arg3[%c6, %c0_32, %c0_33] : memref<33x16x4xbf16, #tpu.memory_space<vmem>>, vector<1x16x4xbf16>
    %40 = vector.shape_cast %39 : vector<1x16x4xbf16> to vector<16x4xbf16>
    %cst_34 = arith.constant dense<0.000000e+00> : vector<16x448xf32>
    %41 = tpu.matmul %40, %38, %cst_34 {dimension_numbers = #tpu.dot_dimension_numbers<[1], [0], [0], [1], [0, 0, 1, 1], [], []>} : vector<16x4xbf16>, vector<4x448xbf16>, vector<16x448xf32> -> vector<16x448xf32>
    %42 = arith.addf %36, %41 : vector<16x448xf32>
    %c0_35 = arith.constant 0 : index
    %c0_36 = arith.constant 0 : index
    %c202 = arith.constant 202 : index
    %43 = vector.load %arg1[%c0_35, %c0_36, %c202] : memref<1x4x812xbf16, #tpu.memory_space<vmem>>, vector<1x4x448xbf16>
    %44 = vector.shape_cast %43 : vector<1x4x448xbf16> to vector<4x448xbf16>
    %c7 = arith.constant 7 : index
    %c0_37 = arith.constant 0 : index
    %c0_38 = arith.constant 0 : index
    %45 = vector.load %arg3[%c7, %c0_37, %c0_38] : memref<33x16x4xbf16, #tpu.memory_space<vmem>>, vector<1x16x4xbf16>
    %46 = vector.shape_cast %45 : vector<1x16x4xbf16> to vector<16x4xbf16>
    %cst_39 = arith.constant dense<0.000000e+00> : vector<16x448xf32>
    %47 = tpu.matmul %46, %44, %cst_39 {dimension_numbers = #tpu.dot_dimension_numbers<[1], [0], [0], [1], [0, 0, 1, 1], [], []>} : vector<16x4xbf16>, vector<4x448xbf16>, vector<16x448xf32> -> vector<16x448xf32>
    %48 = arith.addf %42, %47 : vector<16x448xf32>
    %c0_40 = arith.constant 0 : index
    %c0_41 = arith.constant 0 : index
    %c203 = arith.constant 203 : index
    %49 = vector.load %arg1[%c0_40, %c0_41, %c203] : memref<1x4x812xbf16, #tpu.memory_space<vmem>>, vector<1x4x448xbf16>
    %50 = vector.shape_cast %49 : vector<1x4x448xbf16> to vector<4x448xbf16>
    %c8 = arith.constant 8 : index
    %c0_42 = arith.constant 0 : index
    %c0_43 = arith.constant 0 : index
    %51 = vector.load %arg3[%c8, %c0_42, %c0_43] : memref<33x16x4xbf16, #tpu.memory_space<vmem>>, vector<1x16x4xbf16>
    %52 = vector.shape_cast %51 : vector<1x16x4xbf16> to vector<16x4xbf16>
    %cst_44 = arith.constant dense<0.000000e+00> : vector<16x448xf32>
    %53 = tpu.matmul %52, %50, %cst_44 {dimension_numbers = #tpu.dot_dimension_numbers<[1], [0], [0], [1], [0, 0, 1, 1], [], []>} : vector<16x4xbf16>, vector<4x448xbf16>, vector<16x448xf32> -> vector<16x448xf32>
    %54 = arith.addf %48, %53 : vector<16x448xf32>
    %c0_45 = arith.constant 0 : index
    %c0_46 = arith.constant 0 : index
    %c116 = arith.constant 116 : index
    %55 = vector.load %arg1[%c0_45, %c0_46, %c116] : memref<1x4x812xbf16, #tpu.memory_space<vmem>>, vector<1x4x448xbf16>
    %56 = vector.shape_cast %55 : vector<1x4x448xbf16> to vector<4x448xbf16>
    %c9 = arith.constant 9 : index
    %c0_47 = arith.constant 0 : index
    %c0_48 = arith.constant 0 : index
    %57 = vector.load %arg3[%c9, %c0_47, %c0_48] : memref<33x16x4xbf16, #tpu.memory_space<vmem>>, vector<1x16x4xbf16>
    %58 = vector.shape_cast %57 : vector<1x16x4xbf16> to vector<16x4xbf16>
    %cst_49 = arith.constant dense<0.000000e+00> : vector<16x448xf32>
    %59 = tpu.matmul %58, %56, %cst_49 {dimension_numbers = #tpu.dot_dimension_numbers<[1], [0], [0], [1], [0, 0, 1, 1], [], []>} : vector<16x4xbf16>, vector<4x448xbf16>, vector<16x448xf32> -> vector<16x448xf32>
    %60 = arith.addf %54, %59 : vector<16x448xf32>
    %c0_50 = arith.constant 0 : index
    %c0_51 = arith.constant 0 : index
    %c118 = arith.constant 118 : index
    %61 = vector.load %arg1[%c0_50, %c0_51, %c118] : memref<1x4x812xbf16, #tpu.memory_space<vmem>>, vector<1x4x448xbf16>
    %62 = vector.shape_cast %61 : vector<1x4x448xbf16> to vector<4x448xbf16>
    %c10 = arith.constant 10 : index
    %c0_52 = arith.constant 0 : index
    %c0_53 = arith.constant 0 : index
    %63 = vector.load %arg3[%c10, %c0_52, %c0_53] : memref<33x16x4xbf16, #tpu.memory_space<vmem>>, vector<1x16x4xbf16>
    %64 = vector.shape_cast %63 : vector<1x16x4xbf16> to vector<16x4xbf16>
    %cst_54 = arith.constant dense<0.000000e+00> : vector<16x448xf32>
    %65 = tpu.matmul %64, %62, %cst_54 {dimension_numbers = #tpu.dot_dimension_numbers<[1], [0], [0], [1], [0, 0, 1, 1], [], []>} : vector<16x4xbf16>, vector<4x448xbf16>, vector<16x448xf32> -> vector<16x448xf32>
    %66 = arith.addf %60, %65 : vector<16x448xf32>
    %c0_55 = arith.constant 0 : index
    %c0_56 = arith.constant 0 : index
    %c120 = arith.constant 120 : index
    %67 = vector.load %arg1[%c0_55, %c0_56, %c120] : memref<1x4x812xbf16, #tpu.memory_space<vmem>>, vector<1x4x448xbf16>
    %68 = vector.shape_cast %67 : vector<1x4x448xbf16> to vector<4x448xbf16>
    %c11 = arith.constant 11 : index
    %c0_57 = arith.constant 0 : index
    %c0_58 = arith.constant 0 : index
    %69 = vector.load %arg3[%c11, %c0_57, %c0_58] : memref<33x16x4xbf16, #tpu.memory_space<vmem>>, vector<1x16x4xbf16>
    %70 = vector.shape_cast %69 : vector<1x16x4xbf16> to vector<16x4xbf16>
    %cst_59 = arith.constant dense<0.000000e+00> : vector<16x448xf32>
    %71 = tpu.matmul %70, %68, %cst_59 {dimension_numbers = #tpu.dot_dimension_numbers<[1], [0], [0], [1], [0, 0, 1, 1], [], []>} : vector<16x4xbf16>, vector<4x448xbf16>, vector<16x448xf32> -> vector<16x448xf32>
    %72 = arith.addf %66, %71 : vector<16x448xf32>
    %c0_60 = arith.constant 0 : index
    %c0_61 = arith.constant 0 : index
    %c172 = arith.constant 172 : index
    %73 = vector.load %arg1[%c0_60, %c0_61, %c172] : memref<1x4x812xbf16, #tpu.memory_space<vmem>>, vector<1x4x448xbf16>
    %74 = vector.shape_cast %73 : vector<1x4x448xbf16> to vector<4x448xbf16>
    %c12 = arith.constant 12 : index
    %c0_62 = arith.constant 0 : index
    %c0_63 = arith.constant 0 : index
    %75 = vector.load %arg3[%c12, %c0_62, %c0_63] : memref<33x16x4xbf16, #tpu.memory_space<vmem>>, vector<1x16x4xbf16>
    %76 = vector.shape_cast %75 : vector<1x16x4xbf16> to vector<16x4xbf16>
    %cst_64 = arith.constant dense<0.000000e+00> : vector<16x448xf32>
    %77 = tpu.matmul %76, %74, %cst_64 {dimension_numbers = #tpu.dot_dimension_numbers<[1], [0], [0], [1], [0, 0, 1, 1], [], []>} : vector<16x4xbf16>, vector<4x448xbf16>, vector<16x448xf32> -> vector<16x448xf32>
    %78 = arith.addf %72, %77 : vector<16x448xf32>
    %c0_65 = arith.constant 0 : index
    %c0_66 = arith.constant 0 : index
    %c176 = arith.constant 176 : index
    %79 = vector.load %arg1[%c0_65, %c0_66, %c176] : memref<1x4x812xbf16, #tpu.memory_space<vmem>>, vector<1x4x448xbf16>
    %80 = vector.shape_cast %79 : vector<1x4x448xbf16> to vector<4x448xbf16>
    %c13 = arith.constant 13 : index
    %c0_67 = arith.constant 0 : index
    %c0_68 = arith.constant 0 : index
    %81 = vector.load %arg3[%c13, %c0_67, %c0_68] : memref<33x16x4xbf16, #tpu.memory_space<vmem>>, vector<1x16x4xbf16>
    %82 = vector.shape_cast %81 : vector<1x16x4xbf16> to vector<16x4xbf16>
    %cst_69 = arith.constant dense<0.000000e+00> : vector<16x448xf32>
    %83 = tpu.matmul %82, %80, %cst_69 {dimension_numbers = #tpu.dot_dimension_numbers<[1], [0], [0], [1], [0, 0, 1, 1], [], []>} : vector<16x4xbf16>, vector<4x448xbf16>, vector<16x448xf32> -> vector<16x448xf32>
    %84 = arith.addf %78, %83 : vector<16x448xf32>
    %c0_70 = arith.constant 0 : index
    %c0_71 = arith.constant 0 : index
    %c228 = arith.constant 228 : index
    %85 = vector.load %arg1[%c0_70, %c0_71, %c228] : memref<1x4x812xbf16, #tpu.memory_space<vmem>>, vector<1x4x448xbf16>
    %86 = vector.shape_cast %85 : vector<1x4x448xbf16> to vector<4x448xbf16>
    %c14 = arith.constant 14 : index
    %c0_72 = arith.constant 0 : index
    %c0_73 = arith.constant 0 : index
    %87 = vector.load %arg3[%c14, %c0_72, %c0_73] : memref<33x16x4xbf16, #tpu.memory_space<vmem>>, vector<1x16x4xbf16>
    %88 = vector.shape_cast %87 : vector<1x16x4xbf16> to vector<16x4xbf16>
    %cst_74 = arith.constant dense<0.000000e+00> : vector<16x448xf32>
    %89 = tpu.matmul %88, %86, %cst_74 {dimension_numbers = #tpu.dot_dimension_numbers<[1], [0], [0], [1], [0, 0, 1, 1], [], []>} : vector<16x4xbf16>, vector<4x448xbf16>, vector<16x448xf32> -> vector<16x448xf32>
    %90 = arith.addf %84, %89 : vector<16x448xf32>
    %c0_75 = arith.constant 0 : index
    %c0_76 = arith.constant 0 : index
    %c230 = arith.constant 230 : index
    %91 = vector.load %arg1[%c0_75, %c0_76, %c230] : memref<1x4x812xbf16, #tpu.memory_space<vmem>>, vector<1x4x448xbf16>
    %92 = vector.shape_cast %91 : vector<1x4x448xbf16> to vector<4x448xbf16>
    %c15 = arith.constant 15 : index
    %c0_77 = arith.constant 0 : index
    %c0_78 = arith.constant 0 : index
    %93 = vector.load %arg3[%c15, %c0_77, %c0_78] : memref<33x16x4xbf16, #tpu.memory_space<vmem>>, vector<1x16x4xbf16>
    %94 = vector.shape_cast %93 : vector<1x16x4xbf16> to vector<16x4xbf16>
    %cst_79 = arith.constant dense<0.000000e+00> : vector<16x448xf32>
    %95 = tpu.matmul %94, %92, %cst_79 {dimension_numbers = #tpu.dot_dimension_numbers<[1], [0], [0], [1], [0, 0, 1, 1], [], []>} : vector<16x4xbf16>, vector<4x448xbf16>, vector<16x448xf32> -> vector<16x448xf32>
    %96 = arith.addf %90, %95 : vector<16x448xf32>
    %c0_80 = arith.constant 0 : index
    %c0_81 = arith.constant 0 : index
    %c232 = arith.constant 232 : index
    %97 = vector.load %arg1[%c0_80, %c0_81, %c232] : memref<1x4x812xbf16, #tpu.memory_space<vmem>>, vector<1x4x448xbf16>
    %98 = vector.shape_cast %97 : vector<1x4x448xbf16> to vector<4x448xbf16>
    %c16 = arith.constant 16 : index
    %c0_82 = arith.constant 0 : index
    %c0_83 = arith.constant 0 : index
    %99 = vector.load %arg3[%c16, %c0_82, %c0_83] : memref<33x16x4xbf16, #tpu.memory_space<vmem>>, vector<1x16x4xbf16>
    %100 = vector.shape_cast %99 : vector<1x16x4xbf16> to vector<16x4xbf16>
    %cst_84 = arith.constant dense<0.000000e+00> : vector<16x448xf32>
    %101 = tpu.matmul %100, %98, %cst_84 {dimension_numbers = #tpu.dot_dimension_numbers<[1], [0], [0], [1], [0, 0, 1, 1], [], []>} : vector<16x4xbf16>, vector<4x448xbf16>, vector<16x448xf32> -> vector<16x448xf32>
    %102 = arith.addf %96, %101 : vector<16x448xf32>
    %c0_85 = arith.constant 0 : index
    %c0_86 = arith.constant 0 : index
    %c58 = arith.constant 58 : index
    %103 = vector.load %arg1[%c0_85, %c0_86, %c58] : memref<1x4x812xbf16, #tpu.memory_space<vmem>>, vector<1x4x448xbf16>
    %104 = vector.shape_cast %103 : vector<1x4x448xbf16> to vector<4x448xbf16>
    %c17 = arith.constant 17 : index
    %c0_87 = arith.constant 0 : index
    %c0_88 = arith.constant 0 : index
    %105 = vector.load %arg3[%c17, %c0_87, %c0_88] : memref<33x16x4xbf16, #tpu.memory_space<vmem>>, vector<1x16x4xbf16>
    %106 = vector.shape_cast %105 : vector<1x16x4xbf16> to vector<16x4xbf16>
    %cst_89 = arith.constant dense<0.000000e+00> : vector<16x448xf32>
    %107 = tpu.matmul %106, %104, %cst_89 {dimension_numbers = #tpu.dot_dimension_numbers<[1], [0], [0], [1], [0, 0, 1, 1], [], []>} : vector<16x4xbf16>, vector<4x448xbf16>, vector<16x448xf32> -> vector<16x448xf32>
    %108 = arith.addf %102, %107 : vector<16x448xf32>
    %c0_90 = arith.constant 0 : index
    %c0_91 = arith.constant 0 : index
    %c62 = arith.constant 62 : index
    %109 = vector.load %arg1[%c0_90, %c0_91, %c62] : memref<1x4x812xbf16, #tpu.memory_space<vmem>>, vector<1x4x448xbf16>
    %110 = vector.shape_cast %109 : vector<1x4x448xbf16> to vector<4x448xbf16>
    %c18 = arith.constant 18 : index
    %c0_92 = arith.constant 0 : index
    %c0_93 = arith.constant 0 : index
    %111 = vector.load %arg3[%c18, %c0_92, %c0_93] : memref<33x16x4xbf16, #tpu.memory_space<vmem>>, vector<1x16x4xbf16>
    %112 = vector.shape_cast %111 : vector<1x16x4xbf16> to vector<16x4xbf16>
    %cst_94 = arith.constant dense<0.000000e+00> : vector<16x448xf32>
    %113 = tpu.matmul %112, %110, %cst_94 {dimension_numbers = #tpu.dot_dimension_numbers<[1], [0], [0], [1], [0, 0, 1, 1], [], []>} : vector<16x4xbf16>, vector<4x448xbf16>, vector<16x448xf32> -> vector<16x448xf32>
    %114 = arith.addf %108, %113 : vector<16x448xf32>
    %c0_95 = arith.constant 0 : index
    %c0_96 = arith.constant 0 : index
    %c66 = arith.constant 66 : index
    %115 = vector.load %arg1[%c0_95, %c0_96, %c66] : memref<1x4x812xbf16, #tpu.memory_space<vmem>>, vector<1x4x448xbf16>
    %116 = vector.shape_cast %115 : vector<1x4x448xbf16> to vector<4x448xbf16>
    %c19 = arith.constant 19 : index
    %c0_97 = arith.constant 0 : index
    %c0_98 = arith.constant 0 : index
    %117 = vector.load %arg3[%c19, %c0_97, %c0_98] : memref<33x16x4xbf16, #tpu.memory_space<vmem>>, vector<1x16x4xbf16>
    %118 = vector.shape_cast %117 : vector<1x16x4xbf16> to vector<16x4xbf16>
    %cst_99 = arith.constant dense<0.000000e+00> : vector<16x448xf32>
    %119 = tpu.matmul %118, %116, %cst_99 {dimension_numbers = #tpu.dot_dimension_numbers<[1], [0], [0], [1], [0, 0, 1, 1], [], []>} : vector<16x4xbf16>, vector<4x448xbf16>, vector<16x448xf32> -> vector<16x448xf32>
    %120 = arith.addf %114, %119 : vector<16x448xf32>
    %c0_100 = arith.constant 0 : index
    %c0_101 = arith.constant 0 : index
    %c170 = arith.constant 170 : index
    %121 = vector.load %arg1[%c0_100, %c0_101, %c170] : memref<1x4x812xbf16, #tpu.memory_space<vmem>>, vector<1x4x448xbf16>
    %122 = vector.shape_cast %121 : vector<1x4x448xbf16> to vector<4x448xbf16>
    %c20 = arith.constant 20 : index
    %c0_102 = arith.constant 0 : index
    %c0_103 = arith.constant 0 : index
    %123 = vector.load %arg3[%c20, %c0_102, %c0_103] : memref<33x16x4xbf16, #tpu.memory_space<vmem>>, vector<1x16x4xbf16>
    %124 = vector.shape_cast %123 : vector<1x16x4xbf16> to vector<16x4xbf16>
    %cst_104 = arith.constant dense<0.000000e+00> : vector<16x448xf32>
    %125 = tpu.matmul %124, %122, %cst_104 {dimension_numbers = #tpu.dot_dimension_numbers<[1], [0], [0], [1], [0, 0, 1, 1], [], []>} : vector<16x4xbf16>, vector<4x448xbf16>, vector<16x448xf32> -> vector<16x448xf32>
    %126 = arith.addf %120, %125 : vector<16x448xf32>
    %c0_105 = arith.constant 0 : index
    %c0_106 = arith.constant 0 : index
    %c178 = arith.constant 178 : index
    %127 = vector.load %arg1[%c0_105, %c0_106, %c178] : memref<1x4x812xbf16, #tpu.memory_space<vmem>>, vector<1x4x448xbf16>
    %128 = vector.shape_cast %127 : vector<1x4x448xbf16> to vector<4x448xbf16>
    %c21 = arith.constant 21 : index
    %c0_107 = arith.constant 0 : index
    %c0_108 = arith.constant 0 : index
    %129 = vector.load %arg3[%c21, %c0_107, %c0_108] : memref<33x16x4xbf16, #tpu.memory_space<vmem>>, vector<1x16x4xbf16>
    %130 = vector.shape_cast %129 : vector<1x16x4xbf16> to vector<16x4xbf16>
    %cst_109 = arith.constant dense<0.000000e+00> : vector<16x448xf32>
    %131 = tpu.matmul %130, %128, %cst_109 {dimension_numbers = #tpu.dot_dimension_numbers<[1], [0], [0], [1], [0, 0, 1, 1], [], []>} : vector<16x4xbf16>, vector<4x448xbf16>, vector<16x448xf32> -> vector<16x448xf32>
    %132 = arith.addf %126, %131 : vector<16x448xf32>
    %c0_110 = arith.constant 0 : index
    %c0_111 = arith.constant 0 : index
    %c282 = arith.constant 282 : index
    %133 = vector.load %arg1[%c0_110, %c0_111, %c282] : memref<1x4x812xbf16, #tpu.memory_space<vmem>>, vector<1x4x448xbf16>
    %134 = vector.shape_cast %133 : vector<1x4x448xbf16> to vector<4x448xbf16>
    %c22 = arith.constant 22 : index
    %c0_112 = arith.constant 0 : index
    %c0_113 = arith.constant 0 : index
    %135 = vector.load %arg3[%c22, %c0_112, %c0_113] : memref<33x16x4xbf16, #tpu.memory_space<vmem>>, vector<1x16x4xbf16>
    %136 = vector.shape_cast %135 : vector<1x16x4xbf16> to vector<16x4xbf16>
    %cst_114 = arith.constant dense<0.000000e+00> : vector<16x448xf32>
    %137 = tpu.matmul %136, %134, %cst_114 {dimension_numbers = #tpu.dot_dimension_numbers<[1], [0], [0], [1], [0, 0, 1, 1], [], []>} : vector<16x4xbf16>, vector<4x448xbf16>, vector<16x448xf32> -> vector<16x448xf32>
    %138 = arith.addf %132, %137 : vector<16x448xf32>
    %c0_115 = arith.constant 0 : index
    %c0_116 = arith.constant 0 : index
    %c286 = arith.constant 286 : index
    %139 = vector.load %arg1[%c0_115, %c0_116, %c286] : memref<1x4x812xbf16, #tpu.memory_space<vmem>>, vector<1x4x448xbf16>
    %140 = vector.shape_cast %139 : vector<1x4x448xbf16> to vector<4x448xbf16>
    %c23 = arith.constant 23 : index
    %c0_117 = arith.constant 0 : index
    %c0_118 = arith.constant 0 : index
    %141 = vector.load %arg3[%c23, %c0_117, %c0_118] : memref<33x16x4xbf16, #tpu.memory_space<vmem>>, vector<1x16x4xbf16>
    %142 = vector.shape_cast %141 : vector<1x16x4xbf16> to vector<16x4xbf16>
    %cst_119 = arith.constant dense<0.000000e+00> : vector<16x448xf32>
    %143 = tpu.matmul %142, %140, %cst_119 {dimension_numbers = #tpu.dot_dimension_numbers<[1], [0], [0], [1], [0, 0, 1, 1], [], []>} : vector<16x4xbf16>, vector<4x448xbf16>, vector<16x448xf32> -> vector<16x448xf32>
    %144 = arith.addf %138, %143 : vector<16x448xf32>
    %c0_120 = arith.constant 0 : index
    %c0_121 = arith.constant 0 : index
    %c290 = arith.constant 290 : index
    %145 = vector.load %arg1[%c0_120, %c0_121, %c290] : memref<1x4x812xbf16, #tpu.memory_space<vmem>>, vector<1x4x448xbf16>
    %146 = vector.shape_cast %145 : vector<1x4x448xbf16> to vector<4x448xbf16>
    %c24 = arith.constant 24 : index
    %c0_122 = arith.constant 0 : index
    %c0_123 = arith.constant 0 : index
    %147 = vector.load %arg3[%c24, %c0_122, %c0_123] : memref<33x16x4xbf16, #tpu.memory_space<vmem>>, vector<1x16x4xbf16>
    %148 = vector.shape_cast %147 : vector<1x16x4xbf16> to vector<16x4xbf16>
    %cst_124 = arith.constant dense<0.000000e+00> : vector<16x448xf32>
    %149 = tpu.matmul %148, %146, %cst_124 {dimension_numbers = #tpu.dot_dimension_numbers<[1], [0], [0], [1], [0, 0, 1, 1], [], []>} : vector<16x4xbf16>, vector<4x448xbf16>, vector<16x448xf32> -> vector<16x448xf32>
    %150 = arith.addf %144, %149 : vector<16x448xf32>
    %c0_125 = arith.constant 0 : index
    %c0_126 = arith.constant 0 : index
    %c0_127 = arith.constant 0 : index
    %151 = vector.load %arg1[%c0_125, %c0_126, %c0_127] : memref<1x4x812xbf16, #tpu.memory_space<vmem>>, vector<1x4x448xbf16>
    %152 = vector.shape_cast %151 : vector<1x4x448xbf16> to vector<4x448xbf16>
    %c25 = arith.constant 25 : index
    %c0_128 = arith.constant 0 : index
    %c0_129 = arith.constant 0 : index
    %153 = vector.load %arg3[%c25, %c0_128, %c0_129] : memref<33x16x4xbf16, #tpu.memory_space<vmem>>, vector<1x16x4xbf16>
    %154 = vector.shape_cast %153 : vector<1x16x4xbf16> to vector<16x4xbf16>
    %cst_130 = arith.constant dense<0.000000e+00> : vector<16x448xf32>
    %155 = tpu.matmul %154, %152, %cst_130 {dimension_numbers = #tpu.dot_dimension_numbers<[1], [0], [0], [1], [0, 0, 1, 1], [], []>} : vector<16x4xbf16>, vector<4x448xbf16>, vector<16x448xf32> -> vector<16x448xf32>
    %156 = arith.addf %150, %155 : vector<16x448xf32>
    %c0_131 = arith.constant 0 : index
    %c0_132 = arith.constant 0 : index
    %c6_133 = arith.constant 6 : index
    %157 = vector.load %arg1[%c0_131, %c0_132, %c6_133] : memref<1x4x812xbf16, #tpu.memory_space<vmem>>, vector<1x4x448xbf16>
    %158 = vector.shape_cast %157 : vector<1x4x448xbf16> to vector<4x448xbf16>
    %c26 = arith.constant 26 : index
    %c0_134 = arith.constant 0 : index
    %c0_135 = arith.constant 0 : index
    %159 = vector.load %arg3[%c26, %c0_134, %c0_135] : memref<33x16x4xbf16, #tpu.memory_space<vmem>>, vector<1x16x4xbf16>
    %160 = vector.shape_cast %159 : vector<1x16x4xbf16> to vector<16x4xbf16>
    %cst_136 = arith.constant dense<0.000000e+00> : vector<16x448xf32>
    %161 = tpu.matmul %160, %158, %cst_136 {dimension_numbers = #tpu.dot_dimension_numbers<[1], [0], [0], [1], [0, 0, 1, 1], [], []>} : vector<16x4xbf16>, vector<4x448xbf16>, vector<16x448xf32> -> vector<16x448xf32>
    %162 = arith.addf %156, %161 : vector<16x448xf32>
    %c0_137 = arith.constant 0 : index
    %c0_138 = arith.constant 0 : index
    %c12_139 = arith.constant 12 : index
    %163 = vector.load %arg1[%c0_137, %c0_138, %c12_139] : memref<1x4x812xbf16, #tpu.memory_space<vmem>>, vector<1x4x448xbf16>
    %164 = vector.shape_cast %163 : vector<1x4x448xbf16> to vector<4x448xbf16>
    %c27 = arith.constant 27 : index
    %c0_140 = arith.constant 0 : index
    %c0_141 = arith.constant 0 : index
    %165 = vector.load %arg3[%c27, %c0_140, %c0_141] : memref<33x16x4xbf16, #tpu.memory_space<vmem>>, vector<1x16x4xbf16>
    %166 = vector.shape_cast %165 : vector<1x16x4xbf16> to vector<16x4xbf16>
    %cst_142 = arith.constant dense<0.000000e+00> : vector<16x448xf32>
    %167 = tpu.matmul %166, %164, %cst_142 {dimension_numbers = #tpu.dot_dimension_numbers<[1], [0], [0], [1], [0, 0, 1, 1], [], []>} : vector<16x4xbf16>, vector<4x448xbf16>, vector<16x448xf32> -> vector<16x448xf32>
    %168 = arith.addf %162, %167 : vector<16x448xf32>
    %c0_143 = arith.constant 0 : index
    %c0_144 = arith.constant 0 : index
    %c168 = arith.constant 168 : index
    %169 = vector.load %arg1[%c0_143, %c0_144, %c168] : memref<1x4x812xbf16, #tpu.memory_space<vmem>>, vector<1x4x448xbf16>
    %170 = vector.shape_cast %169 : vector<1x4x448xbf16> to vector<4x448xbf16>
    %c28 = arith.constant 28 : index
    %c0_145 = arith.constant 0 : index
    %c0_146 = arith.constant 0 : index
    %171 = vector.load %arg3[%c28, %c0_145, %c0_146] : memref<33x16x4xbf16, #tpu.memory_space<vmem>>, vector<1x16x4xbf16>
    %172 = vector.shape_cast %171 : vector<1x16x4xbf16> to vector<16x4xbf16>
    %cst_147 = arith.constant dense<0.000000e+00> : vector<16x448xf32>
    %173 = tpu.matmul %172, %170, %cst_147 {dimension_numbers = #tpu.dot_dimension_numbers<[1], [0], [0], [1], [0, 0, 1, 1], [], []>} : vector<16x4xbf16>, vector<4x448xbf16>, vector<16x448xf32> -> vector<16x448xf32>
    %174 = arith.addf %168, %173 : vector<16x448xf32>
    %c0_148 = arith.constant 0 : index
    %c0_149 = arith.constant 0 : index
    %c180 = arith.constant 180 : index
    %175 = vector.load %arg1[%c0_148, %c0_149, %c180] : memref<1x4x812xbf16, #tpu.memory_space<vmem>>, vector<1x4x448xbf16>
    %176 = vector.shape_cast %175 : vector<1x4x448xbf16> to vector<4x448xbf16>
    %c29 = arith.constant 29 : index
    %c0_150 = arith.constant 0 : index
    %c0_151 = arith.constant 0 : index
    %177 = vector.load %arg3[%c29, %c0_150, %c0_151] : memref<33x16x4xbf16, #tpu.memory_space<vmem>>, vector<1x16x4xbf16>
    %178 = vector.shape_cast %177 : vector<1x16x4xbf16> to vector<16x4xbf16>
    %cst_152 = arith.constant dense<0.000000e+00> : vector<16x448xf32>
    %179 = tpu.matmul %178, %176, %cst_152 {dimension_numbers = #tpu.dot_dimension_numbers<[1], [0], [0], [1], [0, 0, 1, 1], [], []>} : vector<16x4xbf16>, vector<4x448xbf16>, vector<16x448xf32> -> vector<16x448xf32>
    %180 = arith.addf %174, %179 : vector<16x448xf32>
    %c0_153 = arith.constant 0 : index
    %c0_154 = arith.constant 0 : index
    %c336 = arith.constant 336 : index
    %181 = vector.load %arg1[%c0_153, %c0_154, %c336] : memref<1x4x812xbf16, #tpu.memory_space<vmem>>, vector<1x4x448xbf16>
    %182 = vector.shape_cast %181 : vector<1x4x448xbf16> to vector<4x448xbf16>
    %c30 = arith.constant 30 : index
    %c0_155 = arith.constant 0 : index
    %c0_156 = arith.constant 0 : index
    %183 = vector.load %arg3[%c30, %c0_155, %c0_156] : memref<33x16x4xbf16, #tpu.memory_space<vmem>>, vector<1x16x4xbf16>
    %184 = vector.shape_cast %183 : vector<1x16x4xbf16> to vector<16x4xbf16>
    %cst_157 = arith.constant dense<0.000000e+00> : vector<16x448xf32>
    %185 = tpu.matmul %184, %182, %cst_157 {dimension_numbers = #tpu.dot_dimension_numbers<[1], [0], [0], [1], [0, 0, 1, 1], [], []>} : vector<16x4xbf16>, vector<4x448xbf16>, vector<16x448xf32> -> vector<16x448xf32>
    %186 = arith.addf %180, %185 : vector<16x448xf32>
    %c0_158 = arith.constant 0 : index
    %c0_159 = arith.constant 0 : index
    %c342 = arith.constant 342 : index
    %187 = vector.load %arg1[%c0_158, %c0_159, %c342] : memref<1x4x812xbf16, #tpu.memory_space<vmem>>, vector<1x4x448xbf16>
    %188 = vector.shape_cast %187 : vector<1x4x448xbf16> to vector<4x448xbf16>
    %c31 = arith.constant 31 : index
    %c0_160 = arith.constant 0 : index
    %c0_161 = arith.constant 0 : index
    %189 = vector.load %arg3[%c31, %c0_160, %c0_161] : memref<33x16x4xbf16, #tpu.memory_space<vmem>>, vector<1x16x4xbf16>
    %190 = vector.shape_cast %189 : vector<1x16x4xbf16> to vector<16x4xbf16>
    %cst_162 = arith.constant dense<0.000000e+00> : vector<16x448xf32>
    %191 = tpu.matmul %190, %188, %cst_162 {dimension_numbers = #tpu.dot_dimension_numbers<[1], [0], [0], [1], [0, 0, 1, 1], [], []>} : vector<16x4xbf16>, vector<4x448xbf16>, vector<16x448xf32> -> vector<16x448xf32>
    %192 = arith.addf %186, %191 : vector<16x448xf32>
    %c0_163 = arith.constant 0 : index
    %c0_164 = arith.constant 0 : index
    %c348 = arith.constant 348 : index
    %193 = vector.load %arg1[%c0_163, %c0_164, %c348] : memref<1x4x812xbf16, #tpu.memory_space<vmem>>, vector<1x4x448xbf16>
    %194 = vector.shape_cast %193 : vector<1x4x448xbf16> to vector<4x448xbf16>
    %c32 = arith.constant 32 : index
    %c0_165 = arith.constant 0 : index
    %c0_166 = arith.constant 0 : index
    %195 = vector.load %arg3[%c32, %c0_165, %c0_166] : memref<33x16x4xbf16, #tpu.memory_space<vmem>>, vector<1x16x4xbf16>
    %196 = vector.shape_cast %195 : vector<1x16x4xbf16> to vector<16x4xbf16>
    %cst_167 = arith.constant dense<0.000000e+00> : vector<16x448xf32>
    %197 = tpu.matmul %196, %194, %cst_167 {dimension_numbers = #tpu.dot_dimension_numbers<[1], [0], [0], [1], [0, 0, 1, 1], [], []>} : vector<16x4xbf16>, vector<4x448xbf16>, vector<16x448xf32> -> vector<16x448xf32>
    %198 = arith.addf %192, %197 : vector<16x448xf32>
    %c0_168 = arith.constant 0 : index
    %c0_169 = arith.constant 0 : index
    %199 = vector.load %arg4[%c0_168, %c0_169] : memref<16x1xf32, #tpu.memory_space<vmem>>, vector<16x1xf32>
    %200 = vector.broadcast %199 : vector<16x1xf32> to vector<16x448xf32>
    %201 = arith.addf %198, %200 : vector<16x448xf32>
    %cst_170 = arith.constant 0.000000e+00 : f32
    %202 = vector.broadcast %cst_170 : f32 to vector<16x448xf32>
    %203 = arith.maximumf %201, %202 : vector<16x448xf32>
    %c0_171 = arith.constant 0 : index
    %c0_172 = arith.constant 0 : index
    %204 = vector.load %arg5[%c0_171, %c0_172] : memref<16x1xf32, #tpu.memory_space<vmem>>, vector<16x1xf32>
    %205 = vector.broadcast %204 : vector<16x1xf32> to vector<16x448xf32>
    %206 = arith.mulf %203, %205 : vector<16x448xf32>
    %cst_173 = arith.constant dense<0.000000e+00> : vector<448xf32>
    %207 = vector.multi_reduction <add>, %206, %cst_173 [0] : vector<16x448xf32> to vector<448xf32>
    %208 = vector.shape_cast %207 : vector<448xf32> to vector<1x448xf32>
    %209 = vector.extract_strided_slice %208 {offsets = [0, 0], sizes = [1, 16], strides = [1, 1]} : vector<1x448xf32> to vector<1x16xf32>
    %210 = vector.extract_strided_slice %208 {offsets = [0, 28], sizes = [1, 16], strides = [1, 1]} : vector<1x448xf32> to vector<1x16xf32>
    %211 = vector.extract_strided_slice %208 {offsets = [0, 56], sizes = [1, 16], strides = [1, 1]} : vector<1x448xf32> to vector<1x16xf32>
    %212 = vector.extract_strided_slice %208 {offsets = [0, 84], sizes = [1, 16], strides = [1, 1]} : vector<1x448xf32> to vector<1x16xf32>
    %213 = vector.extract_strided_slice %208 {offsets = [0, 112], sizes = [1, 16], strides = [1, 1]} : vector<1x448xf32> to vector<1x16xf32>
    %214 = vector.extract_strided_slice %208 {offsets = [0, 140], sizes = [1, 16], strides = [1, 1]} : vector<1x448xf32> to vector<1x16xf32>
    %215 = vector.extract_strided_slice %208 {offsets = [0, 168], sizes = [1, 16], strides = [1, 1]} : vector<1x448xf32> to vector<1x16xf32>
    %216 = vector.extract_strided_slice %208 {offsets = [0, 196], sizes = [1, 16], strides = [1, 1]} : vector<1x448xf32> to vector<1x16xf32>
    %217 = vector.extract_strided_slice %208 {offsets = [0, 224], sizes = [1, 16], strides = [1, 1]} : vector<1x448xf32> to vector<1x16xf32>
    %218 = vector.extract_strided_slice %208 {offsets = [0, 252], sizes = [1, 16], strides = [1, 1]} : vector<1x448xf32> to vector<1x16xf32>
    %219 = vector.extract_strided_slice %208 {offsets = [0, 280], sizes = [1, 16], strides = [1, 1]} : vector<1x448xf32> to vector<1x16xf32>
    %220 = vector.extract_strided_slice %208 {offsets = [0, 308], sizes = [1, 16], strides = [1, 1]} : vector<1x448xf32> to vector<1x16xf32>
    %221 = vector.extract_strided_slice %208 {offsets = [0, 336], sizes = [1, 16], strides = [1, 1]} : vector<1x448xf32> to vector<1x16xf32>
    %222 = vector.extract_strided_slice %208 {offsets = [0, 364], sizes = [1, 16], strides = [1, 1]} : vector<1x448xf32> to vector<1x16xf32>
    %223 = vector.extract_strided_slice %208 {offsets = [0, 392], sizes = [1, 16], strides = [1, 1]} : vector<1x448xf32> to vector<1x16xf32>
    %224 = vector.extract_strided_slice %208 {offsets = [0, 420], sizes = [1, 16], strides = [1, 1]} : vector<1x448xf32> to vector<1x16xf32>
    %225 = tpu.concatenate %209, %210, %211, %212, %213, %214, %215, %216, %217, %218, %219, %220, %221, %222, %223, %224 in 1 : vector<1x16xf32>, vector<1x16xf32>, vector<1x16xf32>, vector<1x16xf32>, vector<1x16xf32>, vector<1x16xf32>, vector<1x16xf32>, vector<1x16xf32>, vector<1x16xf32>, vector<1x16xf32>, vector<1x16xf32>, vector<1x16xf32>, vector<1x16xf32>, vector<1x16xf32>, vector<1x16xf32>, vector<1x16xf32> -> vector<1x256xf32>
    %cst_174 = arith.constant -3.000000e+01 : f32
    %cst_175 = arith.constant 3.000000e+01 : f32
    %226 = vector.broadcast %cst_174 : f32 to vector<1x256xf32>
    %227 = arith.maximumf %226, %225 : vector<1x256xf32>
    %228 = vector.broadcast %cst_175 : f32 to vector<1x256xf32>
    %229 = arith.minimumf %228, %227 : vector<1x256xf32>
    %cst_176 = arith.constant 0.000000e+00 : f32
    %230 = vector.broadcast %cst_176 : f32 to vector<1x256xf32>
    %231 = arith.subf %230, %229 : vector<1x256xf32>
    %232 = math.exp %231 : vector<1x256xf32>
    %cst_177 = arith.constant 1.000000e+00 : f32
    %233 = vector.broadcast %cst_177 : f32 to vector<1x256xf32>
    %234 = arith.addf %233, %232 : vector<1x256xf32>
    %235 = tpu.reciprocal %234 {approx = true} : vector<1x256xf32> -> vector<1x256xf32>
    %c0_178 = arith.constant 0 : index
    %c0_179 = arith.constant 0 : index
    %c0_180 = arith.constant 0 : index
    %236 = vector.load %arg7[%c0_178, %c0_179, %c0_180] : memref<1x1x256xf32, #tpu.memory_space<vmem>>, vector<1x1x256xf32>
    %237 = vector.shape_cast %236 : vector<1x1x256xf32> to vector<1x256xf32>
    %238 = vector.shape_cast %235 : vector<1x256xf32> to vector<1x1x256xf32>
    tpu.vector_store %arg7[%c0_178, %c0_179, %c0_180], %238 {strides = array<i32>} : memref<1x1x256xf32, #tpu.memory_space<vmem>>, vector<1x1x256xf32>,
    %c0_181 = arith.constant 0 : index
    %c0_182 = arith.constant 0 : index
    %c0_183 = arith.constant 0 : index
    %239 = vector.load %arg2[%c0_181, %c0_182, %c0_183] : memref<1x4x256xf32, #tpu.memory_space<vmem>>, vector<1x4x256xf32>
    %240 = vector.shape_cast %239 : vector<1x4x256xf32> to vector<4x256xf32>
    %cst_184 = arith.constant 1.000000e+00 : f32
    %241 = vector.broadcast %cst_184 : f32 to vector<1x256xf32>
    %242 = arith.addf %241, %235 : vector<1x256xf32>
    %243 = vector.broadcast %242 : vector<1x256xf32> to vector<4x256xf32>
    %244 = arith.mulf %240, %243 : vector<4x256xf32>
    %c0_185 = arith.constant 0 : index
    %c0_186 = arith.constant 0 : index
    %c0_187 = arith.constant 0 : index
    %245 = vector.load %arg6[%c0_185, %c0_186, %c0_187] : memref<1x4x256xf32, #tpu.memory_space<vmem>>, vector<1x4x256xf32>
    %246 = vector.shape_cast %245 : vector<1x4x256xf32> to vector<4x256xf32>
    %247 = vector.shape_cast %244 : vector<4x256xf32> to vector<1x4x256xf32>
    tpu.vector_store %arg6[%c0_185, %c0_186, %c0_187], %247 {strides = array<i32>} : memref<1x4x256xf32, #tpu.memory_space<vmem>>, vector<1x4x256xf32>,
    return
  }
  func.func @transform_0(%arg0: i32) -> (i32, i32, i32) {
    %c0_i32 = arith.constant 0 : i32
    %c0_i32_0 = arith.constant 0 : i32
    %c0_i32_1 = arith.constant 0 : i32
    return %arg0, %c0_i32, %c0_i32_0 : i32, i32, i32
  }
  func.func @transform_1(%arg0: i32) -> (i32, i32, i32) {
    %c0_i32 = arith.constant 0 : i32
    %c0_i32_0 = arith.constant 0 : i32
    %c0_i32_1 = arith.constant 0 : i32
    return %arg0, %c0_i32, %c0_i32_0 : i32, i32, i32
  }
  func.func @transform_2(%arg0: i32) -> (i32, i32, i32) {
    %c0_i32 = arith.constant 0 : i32
    %c0_i32_0 = arith.constant 0 : i32
    %c0_i32_1 = arith.constant 0 : i32
    %c0_i32_2 = arith.constant 0 : i32
    return %c0_i32, %c0_i32_0, %c0_i32_1 : i32, i32, i32
  }
  func.func @transform_3(%arg0: i32) -> (i32, i32) {
    %c0_i32 = arith.constant 0 : i32
    %c0_i32_0 = arith.constant 0 : i32
    %c0_i32_1 = arith.constant 0 : i32
    return %c0_i32, %c0_i32_0 : i32, i32
  }
  func.func @transform_4(%arg0: i32) -> (i32, i32) {
    %c0_i32 = arith.constant 0 : i32
    %c0_i32_0 = arith.constant 0 : i32
    %c0_i32_1 = arith.constant 0 : i32
    return %c0_i32, %c0_i32_0 : i32, i32
  }
  func.func @transform_5(%arg0: i32) -> (i32, i32, i32) {
    %c0_i32 = arith.constant 0 : i32
    %c0_i32_0 = arith.constant 0 : i32
    %c0_i32_1 = arith.constant 0 : i32
    return %arg0, %c0_i32, %c0_i32_0 : i32, i32, i32
  }
  func.func @transform_6(%arg0: i32) -> (i32, i32, i32) {
    %c0_i32 = arith.constant 0 : i32
    %c0_i32_0 = arith.constant 0 : i32
    %c0_i32_1 = arith.constant 0 : i32
    return %arg0, %c0_i32, %c0_i32_0 : i32, i32, i32
  }
}

</mosaic_0001>

<bundles_post_ra>
// kernel: bwag_atrous_2d.1
= control target key start
LH: loop header
LB: loop body
LE: loop exit
PB: predicated region body
PF: predicated region fallthrough
CT: control target
= control target key end

     0   :  { %s6287_s21 = smov 0   ;;  %s7044_s0 = inlined_call_operand.vmem [shape: bf16[2,4,812], index: 0, kind: input, shape index: {}]   ;;  %s7045_s1 = inlined_call_operand.vmem [shape: f32[2,4,256], index: 1, kind: input, shape index: {}]   ;;  %s7046_s2 = inlined_call_operand.vmem [shape: bf16[33,16,4], index: 2, kind: input, shape index: {}]   ;;  %s7047_s3 = inlined_call_operand.vmem [shape: f32[16,1], index: 3, kind: input, shape index: {}]   ;;  %s7048_s4 = inlined_call_operand.vmem [shape: f32[16,1], index: 4, kind: input, shape index: {}]   ;;  %s7049_s5 = inlined_call_operand.vmem [shape: f32[2,4,256], index: 5, kind: output, shape index: {0}]   ;;  %s7050_s6 = inlined_call_operand.vmem [shape: f32[2,1,256], index: 6, kind: output, shape index: {1}]  }
   0x1 LB: > { %s5582_s22 = sadd.s32 4294967295, %s6205_s21   ;;  %p5586_p0 = scmp.ge.s32.totalorder %s6205_s21, 1  ;;  %s6205_s21 = sphi %s6287_s21, %s17_s21  }
   0x2   : > { %p225_p1 = scmp.lt.s32.totalorder %s6205_s21, 3 }
   0x4   : > { %p226_p2 = pnand %p5586_p0, %p225_p1 }
   0x5   : > { %p264_p3 = scmp.lt.s32.totalorder (!%p226_p2), %s5582_s22, 1  ;;  %v300_v0 = vlaneseq (!%p226_p2)  ;;  %v6207_v1 = vmov (!%p226_p2), 1983009808   ;;  %v6208_v6 = vmov (!%p226_p2), 0   ;;  %s6209_s27 = smov (!%p226_p2), 111   ;;  %vm321_vm0 = vcmask (!%p226_p2), 908288  }
   0x6   : > { %229 = sbr.rel (%p226_p2) target bundleno = 946 (0x3b2), region = 40  ;;  %v298_v2 = vunpack.c.l.s4 (!%p226_p2), %v6207_v1  ;;  %374 = vmatprep.mubr.bf16.mxu0 (!%p226_p2), %v6208_v6  ;;  %417 = vmatprep.mubr.bf16.mxu1 (!%p226_p2), %v6208_v6  ;;  %s6210_s28 = smov (!%p226_p2), 82   ;;  %vm329_vm1 = vcmask (!%p226_p2), 1041408   ;;  %v6155_v28 = vld [vmem:[%s7046_s2 + $0x8] sm:$0xff] (!%p226_p2)   ;;  %vm325_vm2 = vcmask (!%p226_p2), 31744   ;;  %vm441_vm3 = vcmask (!%p226_p2), 670720  }
   0x7   : > { %v6298_v3 = vshrl.u32 (!%p226_p2), %v300_v0, 7  ;;  %6151 = vset.pattern.permute.xlu1 (!%p226_p2), %v6208_v6  ;;  %6152 = vset.pattern.permute.xlu0 (!%p226_p2), %v6208_v6  ;;  %s6211_s29 = smov (!%p226_p2), 110   ;;  %s6212_s30 = smov (!%p226_p2), 109   ;;  %vm581_vm4 = vcmask (!%p226_p2), 900096   ;;  %v6156_v42 = vld [vmem:[%s7046_s2] sm:$0xff] (!%p226_p2)   ;;  %vm729_vm5 = vcmask (!%p226_p2), 891904  }
   0x8   : > { %v299_v4 = vunpack.c.0.s8 (!%p226_p2), %v298_v2  ;;  %s6213_s7 = smov (!%p226_p2), 83   ;;  %s6214_s8 = smov (!%p226_p2), 81   ;;  %v6157_v55 = vld [vmem:[%s7046_s2 + $0x10] sm:$0xff] (!%p226_p2)   ;;  %vm877_vm6 = vcmask (!%p226_p2), 678912   ;;  %vm1025_vm7 = vcmask (!%p226_p2), 662528   ;;  %vm1184_vm8 = vcmask (!%p226_p2), 449536  }
   0x9   : > { %s6215_s9 = smov (!%p226_p2), 55   ;;  %s6216_s10 = smov (!%p226_p2), 54   ;;  %vm1344_vm9 = vcmask (!%p226_p2), 441344   ;;  %vm1504_vm10 = vcmask (!%p226_p2), 433152   ;;  %vm1664_vm11 = vcmask (!%p226_p2), 97280   ;;  %vm1824_vm12 = vcmask (!%p226_p2), 80896  }
   0xa   : > { %v6302_v5 = vsub.s32 (!%p226_p2), %v299_v4, %v6298_v3  ;;  %s6217_s11 = smov (!%p226_p2), 53   ;;  %s6218_s12 = smov (!%p226_p2), 12   ;;  %vm1984_vm13 = vcmask (!%p226_p2), 64512   ;;  %vm2133_vm14 = vcmask (!%p226_p2), 687104   ;;  %vm2281_vm15 = vcmask (!%p226_p2), 654336  }
   0xb   : > { %s6219_s13 = smov (!%p226_p2), 10   ;;  %s6220_s14 = smov (!%p226_p2), 8  }
   0xc   : > { %s6221_s15 = smov (!%p226_p2), 84   ;;  %s6222_s16 = smov (!%p226_p2), 80  }
   0xd   : > { %s7052_s22 = smov (!%p264_p3, %s5582_s22), 1  ;;  %s6223_s19 = smov 28  }
   0xe   : > { %s6097_s23 = smul.u32 14, %s7052_s22  ;;  %s6224_s24 = smov 26  }
   0xf   : > { %s6238_s20 = smov 48   ;;  %s6244_s25 = smov 92  }
  0x10   : > { %s6309_s26 = scalar_lea.vmem %s7044_s0, %s6097_s23  ;;  %s6242_s23 = smov 104  }
  0x11   : > { %v284_v7 = vld [vmem:[%s6309_s26 + $0x2] sm:$0xff]  ;;  %v6356_v13 = vld.sshfl [vmem:[%s6309_s26 + $0xa] sm:$0x3 pattern:$0x76325410] }
  0x12   : > { %v6315_v8 = vrot.slane %v284_v7, %v6302_v5  ;;  %v296_v9 = vcombine.high %v284_v7, %v284_v7  ;;  %v1618_v14 = vld [vmem:[%s6309_s26] sm:$0xff]  ;;  %v6389_v20 = vld.sshfl [vmem:[%s6309_s26 + $0x8] sm:$0x3 pattern:$0x76325410]  ;;  %v6158_v7 = vld [vmem:[%s7046_s2 + $0x18] sm:$0xff]  }
  0x13   : > { %v6371_v15 = vrot.slane %v1618_v14, %v6302_v5  ;;  %v1630_v16 = vcombine.high %v1618_v14, %v1618_v14 }
  0x14   : > { %313 = vrot.lane.b32.xlu0 %v6315_v8, %s6209_s27  ;;  %v6319_v10 = vrot.slane %v296_v9, %v6302_v5  ;;  %v6323_v11 = vcombine.high %v6315_v8, %v6315_v8 }
  0x15   : > { %v6376_v17 = vcombine.high %v6371_v15, %v6371_v15  ;;  %v6380_v18 = vrot.slane %v1630_v16, %v6302_v5 }
  0x16   : > { %317 = vrot.lane.b32.xlu1 %v6319_v10, %s6209_s27  ;;  %v6328_v12 = vcombine.high %v6319_v10, %v6319_v10 }
  0x17   : > { %v6385_v19 = vcombine.high %v6380_v18, %v6380_v18 }
  0x18   : > { %315 = vrot.lane.b32.xlu0 %v6323_v11, %s6209_s27 }
  0x1a   : > { %319 = vrot.lane.b32.xlu1 %v6328_v12, %s6209_s27  ;;  %s6245_s27 = smov 124  }
  0x1c   : > { %433 = vrot.lane.b32.xlu0 %v6315_v8, %s6210_s28 }
  0x1e   : > { %435 = vrot.lane.b32.xlu1 %v6323_v11, %s6210_s28 }
  0x20   : > { %437 = vrot.lane.b32.xlu0 %v6319_v10, %s6210_s28 }
  0x22   : > { %439 = vrot.lane.b32.xlu1 %v6328_v12, %s6210_s28  ;;  %s6225_s28 = smov 24  }
  0x24   : > { %573 = vrot.lane.b32.xlu0 %v6315_v8, %s6211_s29 }
  0x26   : > { %575 = vrot.lane.b32.xlu1 %v6323_v11, %s6211_s29 }
  0x28   : > { %577 = vrot.lane.b32.xlu0 %v6319_v10, %s6211_s29 }
  0x2a   : > { %579 = vrot.lane.b32.xlu1 %v6328_v12, %s6211_s29  ;;  %s6233_s29 = smov 94  }
  0x2c   : > { %721 = vrot.lane.b32.xlu0 %v6315_v8, %s6212_s30 }
  0x2e   : > { %723 = vrot.lane.b32.xlu1 %v6323_v11, %s6212_s30 }
  0x30   : > { %725 = vrot.lane.b32.xlu0 %v6319_v10, %s6212_s30 }
  0x32   : > { %727 = vrot.lane.b32.xlu1 %v6328_v12, %s6212_s30 }
  0x34   : > { %869 = vrot.lane.b32.xlu0 %v6315_v8, %s6213_s7 }
  0x36   : > { %871 = vrot.lane.b32.xlu1 %v6323_v11, %s6213_s7 }
  0x38   : > { %873 = vrot.lane.b32.xlu0 %v6319_v10, %s6213_s7 }
  0x3a   : > { %875 = vrot.lane.b32.xlu1 %v6328_v12, %s6213_s7  ;;  %s6226_s7 = smov 70  }
  0x3c   : > { %1017 = vrot.lane.b32.xlu0 %v6315_v8, %s6214_s8 }
  0x3e   : > { %1019 = vrot.lane.b32.xlu1 %v6323_v11, %s6214_s8 }
  0x40   : > { %1021 = vrot.lane.b32.xlu0 %v6319_v10, %s6214_s8 }
  0x42   : > { %1023 = vrot.lane.b32.xlu1 %v6328_v12, %s6214_s8  ;;  %s6234_s8 = smov 122  }
  0x44   : > { %1174 = vrot.lane.b32.xlu0 %v6315_v8, %s6215_s9 }
  0x46   : > { %1176 = vrot.lane.b32.xlu1 %v6323_v11, %s6215_s9 }
  0x48   : > { %1178 = vrot.lane.b32.xlu0 %v6319_v10, %s6215_s9 }
  0x4a   : > { %1180 = vrot.lane.b32.xlu1 %v6328_v12, %s6215_s9 }
  0x4c   : > { %1182 = vrot.lane.b32.xlu0 %v6356_v13, %s6215_s9 }
  0x4e   : > { %1334 = vrot.lane.b32.xlu1 %v6315_v8, %s6216_s10 }
  0x50   : > { %1336 = vrot.lane.b32.xlu0 %v6323_v11, %s6216_s10 }
  0x52   : > { %1338 = vrot.lane.b32.xlu1 %v6319_v10, %s6216_s10 }
  0x54   : > { %1340 = vrot.lane.b32.xlu0 %v6328_v12, %s6216_s10 }
  0x56   : > { %1342 = vrot.lane.b32.xlu1 %v6356_v13, %s6216_s10  ;;  %s6227_s10 = smov 66  }
  0x58   : > { %1494 = vrot.lane.b32.xlu0 %v6315_v8, %s6217_s11 }
  0x5a   : > { %1496 = vrot.lane.b32.xlu1 %v6323_v11, %s6217_s11 }
  0x5c   : > { %1498 = vrot.lane.b32.xlu0 %v6319_v10, %s6217_s11 }
  0x5e   : > { %1500 = vrot.lane.b32.xlu1 %v6328_v12, %s6217_s11 }
  0x60   : > { %1502 = vrot.lane.b32.xlu0 %v6356_v13, %s6217_s11  ;;  %s6228_s11 = smov 62  }
  0x62   : > { %1654 = vrot.lane.b32.xlu1 %v6371_v15, %s6218_s12 }
  0x64   : > { %1656 = vrot.lane.b32.xlu0 %v6376_v17, %s6218_s12 }
  0x66   : > { %1658 = vrot.lane.b32.xlu1 %v6380_v18, %s6218_s12 }
  0x68   : > { %1660 = vrot.lane.b32.xlu0 %v6385_v19, %s6218_s12 }
  0x6a   : > { %1662 = vrot.lane.b32.xlu1 %v6389_v20, %s6218_s12 }
  0x6c   : > { %1814 = vrot.lane.b32.xlu0 %v6371_v15, %s6219_s13 }
  0x6e   : > { %1816 = vrot.lane.b32.xlu1 %v6376_v17, %s6219_s13 }
  0x70   : > { %1818 = vrot.lane.b32.xlu0 %v6380_v18, %s6219_s13 }
  0x72   : > { %1820 = vrot.lane.b32.xlu1 %v6385_v19, %s6219_s13 }
  0x74   : > { %1822 = vrot.lane.b32.xlu0 %v6389_v20, %s6219_s13 }
  0x76   : > { %1974 = vrot.lane.b32.xlu1 %v6371_v15, %s6220_s14 }
  0x78   : > { %1976 = vrot.lane.b32.xlu0 %v6376_v17, %s6220_s14 }
  0x7a   : > { %1978 = vrot.lane.b32.xlu1 %v6380_v18, %s6220_s14 }
  0x7c   : > { %1980 = vrot.lane.b32.xlu0 %v6385_v19, %s6220_s14 }
  0x7e   : > { %1982 = vrot.lane.b32.xlu1 %v6389_v20, %s6220_s14 }
  0x80   : > { %2125 = vrot.lane.b32.xlu0 %v6315_v8, %s6221_s15 }
  0x82   : > { %2127 = vrot.lane.b32.xlu1 %v6323_v11, %s6221_s15 }
  0x84   : > { %2129 = vrot.lane.b32.xlu0 %v6319_v10, %s6221_s15 }
  0x86   : > { %v314_v21 = vpop.permute.xlu0 %313  ;;  %2131 = vrot.lane.b32.xlu1 %v6328_v12, %s6221_s15  ;;  %s6229_s15 = smov 86  }
  0x88   : > { %v318_v22 = vpop.permute.xlu1 %317  ;;  %2273 = vrot.lane.b32.xlu0 %v6315_v8, %s6222_s16 }
  0x8a   : > { %v316_v23 = vpop.permute.xlu0 %315  ;;  %2275 = vrot.lane.b32.xlu1 %v6323_v11, %s6222_s16 }
  0x8b   : > { %v323_v24 = vsel %vm321_vm0, %v316_v23, %v318_v22  ;;  %v322_v25 = vsel %vm321_vm0, %v314_v21, %v316_v23 }
  0x8c   : > { %5596 = vmatprep.subr.msk.bf16.mxu0 %vm329_vm1, %v323_v24  ;;  %v320_v26 = vpop.permute.xlu1 %319  ;;  %v331_v27 = vsel %vm329_vm1, %v322_v25, 0  ;;  %2277 = vrot.lane.b32.xlu0 %v6319_v10, %s6222_s16 }
  0x8d   : > { %343 = vmatpush1.bf16.msra.mxu0 %v331_v27  ;;  %5598 = vmatprep.subr.msk.bf16.mxu1 %vm329_vm1, %v320_v26  ;;  %v324_v29 = vsel %vm321_vm0, %v318_v22, %v320_v26  ;;  %vm2440_vm0 = vcmask 228352  }
  0x8e   : > { %v434_v30 = vpop.permute.xlu0 %433  ;;  %v337_v31 = vsel %vm329_vm1, %v324_v29, 0  ;;  %2279 = vrot.lane.b32.xlu1 %v6328_v12, %s6222_s16 }
  0x8f   : > { %386 = vmatpush1.bf16.msra.mxu1 %v337_v31 }
  0x90   : > { %5597 = vmatmul.mubr.msk.bf16.vlgmr.msra.gmra.mrb[0].mxu0 %vm325_vm2, %v6155_v28  ;;  %v436_v32 = vpop.permute.xlu1 %435  ;;  %2430 = vrot.lane.b32.xlu0 %v6315_v8, %s6223_s19 }
  0x91   : > { %v442_v33 = vsel %vm441_vm3, %v434_v30, %v436_v32  ;;  %492 = vmatprep.mubr.bf16.mxu0 %v6208_v6 }
  0x92   : > { %v438_v34 = vpop.permute.xlu0 %437  ;;  %5599 = vmatmul.mubr.msk.bf16.vlgmr.msra.gmra.mrb[0].mxu1 %vm325_vm2, %v6155_v28  ;;  %v449_v35 = vsel %vm329_vm1, %v442_v33, 0  ;;  %2432 = vrot.lane.b32.xlu1 %v6323_v11, %s6223_s19  ;;  %v6159_v28 = vld [vmem:[%s7046_s2 + $0x20] sm:$0xff]  }
  0x93   : > { %v443_v36 = vsel %vm441_vm3, %v436_v32, %v438_v34  ;;  %535 = vmatprep.mubr.bf16.mxu1 %v6208_v6 }
  0x94   : > { %5601 = vmatprep.subr.msk.bf16.mxu0 %vm329_vm1, %v443_v36  ;;  %v440_v37 = vpop.permute.xlu1 %439  ;;  %2434 = vrot.lane.b32.xlu0 %v6319_v10, %s6223_s19 }
  0x95   : > { %v444_v38 = vsel %vm441_vm3, %v438_v34, %v440_v37  ;;  %461 = vmatpush1.bf16.msra.mxu0 %v449_v35  ;;  %5603 = vmatprep.subr.msk.bf16.mxu1 %vm329_vm1, %v440_v37  ;;  %vm2600_vm3 = vcmask 211968  }
  0x96   : > { %v574_v39 = vpop.permute.xlu0 %573  ;;  %v455_v40 = vsel %vm329_vm1, %v444_v38, 0  ;;  %2436 = vrot.lane.b32.xlu1 %v6328_v12, %s6223_s19 }
  0x97   : > { %504 = vmatpush1.bf16.msra.mxu1 %v455_v40 }
  0x98   : > { %v576_v41 = vpop.permute.xlu1 %575  ;;  %2438 = vrot.lane.b32.xlu0 %v6356_v13, %s6223_s19  ;;  %s6230_s19 = smov 78  }
  0x99   : > { %v582_v43 = vsel %vm581_vm4, %v574_v39, %v576_v41 }
  0x9a   : > { %v578_v44 = vpop.permute.xlu0 %577  ;;  %v589_v45 = vsel %vm329_vm1, %v582_v43, 0  ;;  %2590 = vrot.lane.b32.xlu1 %v6315_v8, %s6224_s24 }
  0x9b   : > { %v583_v46 = vsel %vm581_vm4, %v576_v41, %v578_v44  ;;  %v6160_v41 = vld [vmem:[%s7046_s2 + $0x28] sm:$0xff]  }
  0x9c   : > { %5602 = vmatmul.mubr.msk.bf16.vlgmr.msra.gmra.mrb[0].mxu0 %vm325_vm2, %v6156_v42  ;;  %5608 = vmatprep.subr.msk.bf16.mxu0 %vm329_vm1, %v583_v46  ;;  %v580_v47 = vpop.permute.xlu1 %579 }
  0x9d   : > { %601 = vmatpush1.bf16.msra.mxu0 %v589_v45  ;;  %v584_v48 = vsel %vm581_vm4, %v578_v44, %v580_v47  ;;  %5610 = vmatprep.subr.msk.bf16.mxu1 %vm329_vm1, %v580_v47  ;;  %vm2760_vm4 = vcmask 195584  }
  0x9e   : > { %5604 = vmatmul.mubr.msk.bf16.vlgmr.msra.gmra.mrb[0].mxu1 %vm325_vm2, %v6156_v42  ;;  %v595_v49 = vsel %vm329_vm1, %v584_v48, 0  ;;  %v722_v50 = vpop.permute.xlu0 %721  ;;  %632 = vmatprep.mubr.bf16.mxu0 %v6208_v6 }
  0x9f   : > { %644 = vmatpush1.bf16.msra.mxu1 %v595_v49  ;;  %675 = vmatprep.mubr.bf16.mxu1 %v6208_v6 }
  0xa0   : > { %v724_v51 = vpop.permute.xlu1 %723  ;;  %2592 = vrot.lane.b32.xlu0 %v6323_v11, %s6224_s24  ;;  %2594 = vrot.lane.b32.xlu1 %v6319_v10, %s6224_s24 }
  0xa1   : > { %v730_v53 = vsel %vm729_vm5, %v722_v50, %v724_v51  ;;  %v6161_v50 = vld [vmem:[%s7046_s2 + $0x30] sm:$0xff]  }
  0xa2   : > { %v726_v52 = vpop.permute.xlu0 %725  ;;  %v737_v58 = vsel %vm329_vm1, %v730_v53, 0 }
  0xa3   : > { %v731_v54 = vsel %vm729_vm5, %v724_v51, %v726_v52 }
  0xa4   : > { %5615 = vmatprep.subr.msk.bf16.mxu0 %vm329_vm1, %v731_v54  ;;  %v728_v56 = vpop.permute.xlu1 %727  ;;  %2596 = vrot.lane.b32.xlu0 %v6328_v12, %s6224_s24 }
  0xa5   : > { %v732_v57 = vsel %vm729_vm5, %v726_v52, %v728_v56  ;;  %5617 = vmatprep.subr.msk.bf16.mxu1 %vm329_vm1, %v728_v56  ;;  %2598 = vrot.lane.b32.xlu1 %v6356_v13, %s6224_s24  ;;  %s6231_s24 = smov 102   ;;  %vm2909_vm5 = vcmask 572416  }
  0xa6   : > { %v870_v59 = vpop.permute.xlu0 %869  ;;  %v743_v60 = vsel %vm329_vm1, %v732_v57, 0 }
  0xa8   : > { %5609 = vmatmul.mubr.msk.bf16.vlgmr.msra.gmra.mrb[0].mxu0 %vm325_vm2, %v6157_v55  ;;  %v872_v61 = vpop.permute.xlu1 %871  ;;  %2750 = vrot.lane.b32.xlu0 %v6315_v8, %s6225_s28 }
  0xa9   : > { %749 = vmatpush1.bf16.msra.mxu0 %v737_v58  ;;  %780 = vmatprep.mubr.bf16.mxu0 %v6208_v6  ;;  %v878_v4 = vsel %vm877_vm6, %v870_v59, %v872_v61  ;;  %v3626_v59 = vld [vmem:[%s6309_s26 + $0x4] sm:$0xff] }
  0xaa   : > { %5611 = vmatmul.mubr.msk.bf16.vlgmr.msra.gmra.mrb[0].mxu1 %vm325_vm2, %v6157_v55  ;;  %v874_v62 = vpop.permute.xlu0 %873  ;;  %2752 = vrot.lane.b32.xlu1 %v6323_v11, %s6225_s28  ;;  %v885_v16 = vsel %vm329_vm1, %v878_v4, 0 }
  0xab   : > { %792 = vmatpush1.bf16.msra.mxu1 %v743_v60  ;;  %v879_v63 = vsel %vm877_vm6, %v872_v61, %v874_v62  ;;  %823 = vmatprep.mubr.bf16.mxu1 %v6208_v6 }
  0xac   : > { %5622 = vmatprep.subr.msk.bf16.mxu0 %vm329_vm1, %v879_v63  ;;  %v876_v1 = vpop.permute.xlu1 %875  ;;  %2754 = vrot.lane.b32.xlu0 %v6319_v10, %s6225_s28  ;;  %v6162_v63 = vld [vmem:[%s7046_s2 + $0x38] sm:$0xff]  }
  0xad   : > { %5624 = vmatprep.subr.msk.bf16.mxu1 %vm329_vm1, %v876_v1  ;;  %v880_v14 = vsel %vm877_vm6, %v874_v62, %v876_v1  ;;  %v6566_v1 = vrot.slane %v3626_v59, %v6302_v5  ;;  %vm3057_vm6 = vcmask 539648  }
  0xae   : > { %v1018_v2 = vpop.permute.xlu0 %1017  ;;  %2756 = vrot.lane.b32.xlu1 %v6328_v12, %s6225_s28  ;;  %v891_v23 = vsel %vm329_vm1, %v880_v14, 0 }
  0xb0   : > { %v1020_v9 = vpop.permute.xlu1 %1019  ;;  %2758 = vrot.lane.b32.xlu0 %v6356_v13, %s6225_s28  ;;  %s6232_s28 = smov 98  }
  0xb1   : > { %v1026_v27 = vsel %vm1025_vm7, %v1018_v2, %v1020_v9  ;;  %v3636_v2 = vcombine.high %v3626_v59, %v3626_v59 }
  0xb2   : > { %v1022_v21 = vpop.permute.xlu0 %1021  ;;  %2901 = vrot.lane.b32.xlu1 %v6371_v15, %s6226_s7  ;;  %v1033_v31 = vsel %vm329_vm1, %v1026_v27, 0 }
  0xb3   : > { %v1027_v22 = vsel %vm1025_vm7, %v1020_v9, %v1022_v21 }
  0xb4   : > { %5616 = vmatmul.mubr.msk.bf16.vlgmr.msra.gmra.mrb[0].mxu0 %vm325_vm2, %v6158_v7  ;;  %v1024_v24 = vpop.permute.xlu1 %1023  ;;  %2903 = vrot.lane.b32.xlu0 %v6376_v17, %s6226_s7 }
  0xb5   : > { %897 = vmatpush1.bf16.msra.mxu0 %v885_v16  ;;  %928 = vmatprep.mubr.bf16.mxu0 %v6208_v6  ;;  %v1028_v30 = vsel %vm1025_vm7, %v1022_v21, %v1024_v24  ;;  %v6582_v16 = vcombine.high %v6566_v1, %v6566_v1  ;;  %vm3216_vm7 = vcmask 506880  }
  0xb6   : > { %5618 = vmatmul.mubr.msk.bf16.vlgmr.msra.gmra.mrb[0].mxu1 %vm325_vm2, %v6158_v7  ;;  %5629 = vmatprep.subr.msk.bf16.mxu0 %vm329_vm1, %v1027_v22  ;;  %v1175_v13 = vpop.permute.xlu0 %1174  ;;  %v1039_v34 = vsel %vm329_vm1, %v1028_v30, 0 }
  0xb7   : > { %940 = vmatpush1.bf16.msra.mxu1 %v891_v23  ;;  %971 = vmatprep.mubr.bf16.mxu1 %v6208_v6 }
  0xb8   : > { %5631 = vmatprep.subr.msk.bf16.mxu1 %vm329_vm1, %v1024_v24  ;;  %v1177_v25 = vpop.permute.xlu1 %1176  ;;  %2905 = vrot.lane.b32.xlu1 %v6380_v18, %s6226_s7 }
  0xb9   : > { %2907 = vrot.lane.b32.xlu0 %v6385_v19, %s6226_s7  ;;  %v1185_v40 = vsel %vm1184_vm8, %v1175_v13, %v1177_v25  ;;  %v6163_v13 = vld [vmem:[%s7046_s2 + $0x40] sm:$0xff]   ;;  %s5592_s7 = sshll.u32 %s7052_s22, 1 }
  0xba   : > { %v1179_v26 = vpop.permute.xlu0 %1178  ;;  %v1193_v44 = vsel %vm329_vm1, %v1185_v40, 0  ;;  %v4206_v40 = vld [vmem:[%s6309_s26] sm:$0xff] }
  0xbb   : > { %v1186_v33 = vsel %vm1184_vm8, %v1177_v25, %v1179_v26 }
  0xbc   : > { %v1181_v29 = vpop.permute.xlu1 %1180  ;;  %3049 = vrot.lane.b32.xlu1 %v6371_v15, %s6227_s10 }
  0xbd   : > { %3051 = vrot.lane.b32.xlu0 %v6376_v17, %s6227_s10  ;;  %v1187_v43 = vsel %vm1184_vm8, %v1179_v26, %v1181_v29 }
  0xbe   : > { %v1183_v32 = vpop.permute.xlu0 %1182  ;;  %v1199_v46 = vsel %vm329_vm1, %v1187_v43, 0 }
  0xbf   : > { %v1188_v36 = vsel %vm1184_vm8, %v1181_v29, %v1183_v32  ;;  %vm3365_vm8 = vcmask 703488  }
  0xc0   : > { %5623 = vmatmul.mubr.msk.bf16.vlgmr.msra.gmra.mrb[0].mxu0 %vm325_vm2, %v6159_v28  ;;  %v1335_v35 = vpop.permute.xlu1 %1334  ;;  %3053 = vrot.lane.b32.xlu1 %v6380_v18, %s6227_s10 }
  0xc1   : > { %1045 = vmatpush1.bf16.msra.mxu0 %v1033_v31  ;;  %1076 = vmatprep.mubr.bf16.mxu0 %v6208_v6 }
  0xc2   : > { %5625 = vmatmul.mubr.msk.bf16.vlgmr.msra.gmra.mrb[0].mxu1 %vm325_vm2, %v6159_v28  ;;  %5637 = vmatprep.subr.msk.bf16.mxu0 %vm329_vm1, %v1186_v33  ;;  %v1337_v37 = vpop.permute.xlu0 %1336 }
  0xc3   : > { %1088 = vmatpush1.bf16.msra.mxu1 %v1039_v34  ;;  %1119 = vmatprep.mubr.bf16.mxu1 %v6208_v6  ;;  %v1345_v49 = vsel %vm1344_vm9, %v1335_v35, %v1337_v37  ;;  %v6164_v35 = vld [vmem:[%s7046_s2 + $0x48] sm:$0xff]  }
  0xc4   : > { %5639 = vmatprep.subr.msk.bf16.mxu1 %vm329_vm1, %v1188_v36  ;;  %v1339_v38 = vpop.permute.xlu1 %1338  ;;  %3055 = vrot.lane.b32.xlu0 %v6385_v19, %s6227_s10  ;;  %s282_s10 = scalar_lea.vmem %s7050_s6, %s5592_s7 }
  0xc5   : > { %3206 = vrot.lane.b32.xlu1 %v6371_v15, %s6228_s11  ;;  %v1346_v15 = vsel %vm1344_vm9, %v1337_v37, %v1339_v38 }
  0xc6   : > { %v1341_v39 = vpop.permute.xlu0 %1340 }
  0xc7   : > { %v1347_v52 = vsel %vm1344_vm9, %v1339_v38, %v1341_v39 }
  0xc8   : > { %v1343_v42 = vpop.permute.xlu1 %1342  ;;  %3208 = vrot.lane.b32.xlu0 %v6376_v17, %s6228_s11  ;;  %v1359_v55 = vsel %vm329_vm1, %v1347_v52, 0 }
  0xc9   : > { %3210 = vrot.lane.b32.xlu1 %v6380_v18, %s6228_s11  ;;  %v1348_v17 = vsel %vm1344_vm9, %v1341_v39, %v1343_v42  ;;  %vm3513_vm9 = vcmask 637952  }
  0xca   : > { %v1495_v45 = vpop.permute.xlu0 %1494 }
  0xcc   : > { %5630 = vmatmul.mubr.msk.bf16.vlgmr.msra.gmra.mrb[0].mxu0 %vm325_vm2, %v6160_v41  ;;  %v1497_v47 = vpop.permute.xlu1 %1496  ;;  %3212 = vrot.lane.b32.xlu0 %v6385_v19, %s6228_s11 }
  0xcd   : > { %1205 = vmatpush1.bf16.msra.mxu0 %v1193_v44  ;;  %1236 = vmatprep.mubr.bf16.mxu0 %v6208_v6  ;;  %v1505_v62 = vsel %vm1504_vm10, %v1495_v45, %v1497_v47  ;;  %v6630_v44 = vrot.slane %v4206_v40, %v6302_v5  ;;  %v4216_v45 = vcombine.high %v4206_v40, %v4206_v40 }
  0xce   : > { %5632 = vmatmul.mubr.msk.bf16.vlgmr.msra.gmra.mrb[0].mxu1 %vm325_vm2, %v6160_v41  ;;  %5645 = vmatprep.subr.msk.bf16.mxu0 %vm329_vm1, %v1346_v15  ;;  %v1499_v18 = vpop.permute.xlu0 %1498 }
  0xcf   : > { %1248 = vmatpush1.bf16.msra.mxu1 %v1199_v46  ;;  %1279 = vmatprep.mubr.bf16.mxu1 %v6208_v6  ;;  %v1506_v54 = vsel %vm1504_vm10, %v1497_v47, %v1499_v18  ;;  %v6639_v47 = vcombine.high %v6630_v44, %v6630_v44 }
  0xd0   : > { %5647 = vmatprep.subr.msk.bf16.mxu1 %vm329_vm1, %v1348_v17  ;;  %v1501_v48 = vpop.permute.xlu1 %1500  ;;  %3214 = vrot.lane.b32.xlu1 %v6389_v20, %s6228_s11  ;;  %v1353_v20 = vsel %vm329_vm1, %v1345_v49, 0  ;;  %v6643_v17 = vrot.slane %v4216_v45, %v6302_v5  ;;  %s6235_s11 = smov 116  }
  0xd1   : > { %3357 = vrot.lane.b32.xlu0 %v6315_v8, %s6229_s15 }
  0xd2   : > { %v1503_v19 = vpop.permute.xlu0 %1502 }
  0xd3   : > { %v1508_v57 = vsel %vm1504_vm10, %v1501_v48, %v1503_v19 }
  0xd4   : > { %v1655_v51 = vpop.permute.xlu1 %1654  ;;  %3359 = vrot.lane.b32.xlu1 %v6323_v11, %s6229_s15 }
  0xd5   : > { %3361 = vrot.lane.b32.xlu0 %v6319_v10, %s6229_s15 }
  0xd6   : > { %v1657_v53 = vpop.permute.xlu0 %1656 }
  0xd7   : > { %v1665_v24 = vsel %vm1664_vm11, %v1655_v51, %v1657_v53 }
  0xd8   : > { %5638 = vmatmul.mubr.msk.bf16.vlgmr.msra.gmra.mrb[0].mxu0 %vm325_vm2, %v6161_v50  ;;  %v1659_v56 = vpop.permute.xlu1 %1658  ;;  %3363 = vrot.lane.b32.xlu1 %v6328_v12, %s6229_s15  ;;  %v1673_v26 = vsel %vm329_vm1, %v1665_v24, 0  ;;  %s6236_s15 = smov 88   ;;  %v6168_v24 = vld [vmem:[%s7046_s2 + $0x60] sm:$0xff]  }
  0xd9   : > { %1365 = vmatpush1.bf16.msra.mxu0 %v1353_v20  ;;  %1396 = vmatprep.mubr.bf16.mxu0 %v6208_v6  ;;  %v1666_v7 = vsel %vm1664_vm11, %v1657_v53, %v1659_v56 }
  0xda   : > { %5640 = vmatmul.mubr.msk.bf16.vlgmr.msra.gmra.mrb[0].mxu1 %vm325_vm2, %v6161_v50  ;;  %5653 = vmatprep.subr.msk.bf16.mxu0 %vm329_vm1, %v1506_v54  ;;  %v1661_v58 = vpop.permute.xlu0 %1660  ;;  %v6652_v50 = vcombine.high %v6643_v17, %v6643_v17 }
  0xdb   : > { %1408 = vmatpush1.bf16.msra.mxu1 %v1359_v55  ;;  %1439 = vmatprep.mubr.bf16.mxu1 %v6208_v6  ;;  %v1667_v25 = vsel %vm1664_vm11, %v1659_v56, %v1661_v58  ;;  %v4502_v56 = vld [vmem:[%s6309_s26 + $0x2] sm:$0xff] }
  0xdc   : > { %5655 = vmatprep.subr.msk.bf16.mxu1 %vm329_vm1, %v1508_v57  ;;  %3505 = vrot.lane.b32.xlu0 %v6315_v8, %s6230_s19  ;;  %v1663_v60 = vpop.permute.xlu1 %1662  ;;  %v1507_v8 = vsel %vm1504_vm10, %v1499_v18, %v1501_v48  ;;  %v1679_v30 = vsel %vm329_vm1, %v1667_v25, 0  ;;  %v6165_v48 = vld [vmem:[%s7046_s2 + $0x50] sm:$0xff]   ;;  %vm3661_vm10 = vcmask 834560  }
  0xdd   : > { %3507 = vrot.lane.b32.xlu1 %v6323_v11, %s6230_s19  ;;  %v1513_v11 = vsel %vm329_vm1, %v1505_v62, 0  ;;  %v1519_v9 = vsel %vm329_vm1, %v1507_v8, 0  ;;  %v4512_v62 = vcombine.high %v4502_v56, %v4502_v56 }
  0xde   : > { %v1815_v61 = vpop.permute.xlu0 %1814 }
  0xe0   : > { %3509 = vrot.lane.b32.xlu0 %v6319_v10, %s6230_s19  ;;  %v1817_v4 = vpop.permute.xlu1 %1816  ;;  %v6576_v10 = vrot.slane %v3636_v2, %v6302_v5 }
  0xe1   : > { %3511 = vrot.lane.b32.xlu1 %v6328_v12, %s6230_s19  ;;  %v1668_v12 = vsel %vm1664_vm11, %v1661_v58, %v1663_v60  ;;  %v1825_v34 = vsel %vm1824_vm12, %v1815_v61, %v1817_v4  ;;  %v6166_v60 = vld [vmem:[%s7046_s2 + $0x58] sm:$0xff]   ;;  %v4519_v61 = vrot.slane %v4502_v56, %v6302_v5  ;;  %s6237_s19 = smov 76   ;;  %vm3809_vm11 = vcmask 801792  }
  0xe2   : > { %v1819_v14 = vpop.permute.xlu0 %1818  ;;  %v6592_v22 = vcombine.high %v6576_v10, %v6576_v10  ;;  %v1833_v37 = vsel %vm329_vm1, %v1825_v34, 0  ;;  %v6169_v34 = vld [vmem:[%s7046_s2 + $0x68] sm:$0xff]   ;;  %v6171_v56 = vld [vmem:[%s7046_s2 + $0x78] sm:$0xff]  }
  0xe3   : > { %v1826_v29 = vsel %vm1824_vm12, %v1817_v4, %v1819_v14 }
  0xe4   : > { %5646 = vmatmul.mubr.msk.bf16.vlgmr.msra.gmra.mrb[0].mxu0 %vm325_vm2, %v6162_v63  ;;  %3653 = vrot.lane.b32.xlu0 %v6566_v1, %s6231_s24  ;;  %v1821_v21 = vpop.permute.xlu1 %1820 }
  0xe5   : > { %1525 = vmatpush1.bf16.msra.mxu0 %v1513_v11  ;;  %1556 = vmatprep.mubr.bf16.mxu0 %v6208_v6  ;;  %v1827_v36 = vsel %vm1824_vm12, %v1819_v14, %v1821_v21  ;;  %v4527_v14 = vcombine.high %v4519_v61, %v4519_v61 }
  0xe6   : > { %5648 = vmatmul.mubr.msk.bf16.vlgmr.msra.gmra.mrb[0].mxu1 %vm325_vm2, %v6162_v63  ;;  %5661 = vmatprep.subr.msk.bf16.mxu0 %vm329_vm1, %v1666_v7  ;;  %v1823_v23 = vpop.permute.xlu0 %1822  ;;  %v1839_v42 = vsel %vm329_vm1, %v1827_v36, 0 }
  0xe7   : > { %1568 = vmatpush1.bf16.msra.mxu1 %v1519_v9  ;;  %1599 = vmatprep.mubr.bf16.mxu1 %v6208_v6  ;;  %v1828_v31 = vsel %vm1824_vm12, %v1821_v21, %v1823_v23  ;;  %v4526_v9 = vrot.slane %v4512_v62, %v6302_v5  ;;  %vm3957_vm12 = vcmask 769024  }
  0xe8   : > { %5663 = vmatprep.subr.msk.bf16.mxu1 %vm329_vm1, %v1668_v12  ;;  %3657 = vrot.lane.b32.xlu0 %v6576_v10, %s6231_s24  ;;  %v1975_v27 = vpop.permute.xlu1 %1974 }
  0xe9   : > { %3655 = vrot.lane.b32.xlu1 %v6582_v16, %s6231_s24  ;;  %v4528_v21 = vcombine.high %v4526_v9, %v4526_v9 }
  0xea   : > { %v1977_v28 = vpop.permute.xlu0 %1976 }
  0xeb   : > { %v1985_v18 = vsel %vm1984_vm13, %v1975_v27, %v1977_v28 }
  0xec   : > { %3801 = vrot.lane.b32.xlu0 %v6566_v1, %s6232_s28  ;;  %v1979_v32 = vpop.permute.xlu1 %1978  ;;  %v1993_v52 = vsel %vm329_vm1, %v1985_v18, 0 }
  0xed   : > { %3659 = vrot.lane.b32.xlu1 %v6592_v22, %s6231_s24  ;;  %v1986_v41 = vsel %vm1984_vm13, %v1977_v28, %v1979_v32  ;;  %s6243_s24 = smov 20  }
  0xee   : > { %v1981_v33 = vpop.permute.xlu0 %1980 }
  0xef   : > { %v1987_v51 = vsel %vm1984_vm13, %v1979_v32, %v1981_v33 }
  0xf0   : > { %5654 = vmatmul.mubr.msk.bf16.vlgmr.msra.gmra.mrb[0].mxu0 %vm325_vm2, %v6163_v13  ;;  %3805 = vrot.lane.b32.xlu0 %v6576_v10, %s6232_s28  ;;  %v1983_v38 = vpop.permute.xlu1 %1982  ;;  %v1999_v53 = vsel %vm329_vm1, %v1987_v51, 0 }
  0xf1   : > { %1685 = vmatpush1.bf16.msra.mxu0 %v1673_v26  ;;  %1716 = vmatprep.mubr.bf16.mxu0 %v6208_v6  ;;  %v1988_v43 = vsel %vm1984_vm13, %v1981_v33, %v1983_v38  ;;  %vm4241_vm13 = vcmask 998400  }
  0xf2   : > { %5656 = vmatmul.mubr.msk.bf16.vlgmr.msra.gmra.mrb[0].mxu1 %vm325_vm2, %v6163_v13  ;;  %5669 = vmatprep.subr.msk.bf16.mxu0 %vm329_vm1, %v1826_v29  ;;  %v2126_v39 = vpop.permute.xlu0 %2125 }
  0xf3   : > { %1728 = vmatpush1.bf16.msra.mxu1 %v1679_v30  ;;  %1759 = vmatprep.mubr.bf16.mxu1 %v6208_v6 }
  0xf4   : > { %5671 = vmatprep.subr.msk.bf16.mxu1 %vm329_vm1, %v1828_v31  ;;  %3803 = vrot.lane.b32.xlu1 %v6582_v16, %s6232_s28  ;;  %v2128_v15 = vpop.permute.xlu1 %2127 }
  0xf5   : > { %3949 = vrot.lane.b32.xlu0 %v6566_v1, %s6233_s29  ;;  %v2134_v59 = vsel %vm2133_vm14, %v2126_v39, %v2128_v15 }
  0xf6   : > { %v2130_v46 = vpop.permute.xlu0 %2129  ;;  %v2141_v2 = vsel %vm329_vm1, %v2134_v59, 0 }
  0xf7   : > { %v2135_v20 = vsel %vm2133_vm14, %v2128_v15, %v2130_v46 }
  0xf8   : > { %3807 = vrot.lane.b32.xlu1 %v6592_v22, %s6232_s28  ;;  %v2132_v19 = vpop.permute.xlu1 %2131  ;;  %s6240_s28 = smov 36  }
  0xf9   : > { %3953 = vrot.lane.b32.xlu0 %v6576_v10, %s6233_s29  ;;  %v2136_v63 = vsel %vm2133_vm14, %v2130_v46, %v2132_v19  ;;  %v6170_v46 = vld [vmem:[%s7046_s2 + $0x70] sm:$0xff]   ;;  %vm4389_vm14 = vcmask 949248  }
  0xfa   : > { %v2274_v49 = vpop.permute.xlu0 %2273  ;;  %v2147_v4 = vsel %vm329_vm1, %v2136_v63, 0 }
  0xfc   : > { %5662 = vmatmul.mubr.msk.bf16.vlgmr.msra.gmra.mrb[0].mxu0 %vm325_vm2, %v6164_v35  ;;  %3951 = vrot.lane.b32.xlu1 %v6582_v16, %s6233_s29  ;;  %v2276_v54 = vpop.permute.xlu1 %2275 }
  0xfd   : > { %1845 = vmatpush1.bf16.msra.mxu0 %v1833_v37  ;;  %1876 = vmatprep.mubr.bf16.mxu0 %v6208_v6  ;;  %v2282_v23 = vsel %vm2281_vm15, %v2274_v49, %v2276_v54 }
  0xfe   : > { %5664 = vmatmul.mubr.msk.bf16.vlgmr.msra.gmra.mrb[0].mxu1 %vm325_vm2, %v6164_v35  ;;  %5677 = vmatprep.subr.msk.bf16.mxu0 %vm329_vm1, %v1986_v41  ;;  %v2278_v55 = vpop.permute.xlu0 %2277  ;;  %v2289_v25 = vsel %vm329_vm1, %v2282_v23, 0 }
  0xff   : > { %1888 = vmatpush1.bf16.msra.mxu1 %v1839_v42  ;;  %1919 = vmatprep.mubr.bf16.mxu1 %v6208_v6  ;;  %v2283_v11 = vsel %vm2281_vm15, %v2276_v54, %v2278_v55  ;;  %v5814_v42 = vld.sshfl [vmem:[%s6309_s26 + $0xc] sm:$0x3 pattern:$0x76325410]  ;;  %s6239_s26 = smov 42  }
 0x100   : > { %5679 = vmatprep.subr.msk.bf16.mxu1 %vm329_vm1, %v1988_v43  ;;  %3955 = vrot.lane.b32.xlu1 %v6592_v22, %s6233_s29  ;;  %v2280_v57 = vpop.permute.xlu1 %2279  ;;  %s6249_s29 = smov 56  }
 0x101   : > { %4233 = vrot.lane.b32.xlu0 %v6630_v44, %s6234_s8  ;;  %v2284_v13 = vsel %vm2281_vm15, %v2278_v55, %v2280_v57 }
 0x102   : > { %v2431_v58 = vpop.permute.xlu0 %2430  ;;  %v2295_v29 = vsel %vm329_vm1, %v2284_v13, 0 }
 0x104   : > { %4235 = vrot.lane.b32.xlu1 %v6639_v47, %s6234_s8  ;;  %v2433_v8 = vpop.permute.xlu1 %2432 }
 0x105   : > { %4237 = vrot.lane.b32.xlu0 %v6643_v17, %s6234_s8  ;;  %v2441_v33 = vsel %vm2440_vm0, %v2431_v58, %v2433_v8 }
 0x106   : > { %v2435_v7 = vpop.permute.xlu0 %2434  ;;  %v2449_v36 = vsel %vm329_vm1, %v2441_v33, 0 }
 0x107   : > { %v2442_v28 = vsel %vm2440_vm0, %v2433_v8, %v2435_v7 }
 0x108   : > { %5670 = vmatmul.mubr.msk.bf16.vlgmr.msra.gmra.mrb[0].mxu0 %vm325_vm2, %v6165_v48  ;;  %4239 = vrot.lane.b32.xlu1 %v6652_v50, %s6234_s8  ;;  %v2437_v12 = vpop.permute.xlu1 %2436 }
 0x109   : > { %2005 = vmatpush1.bf16.msra.mxu0 %v1993_v52  ;;  %2036 = vmatprep.mubr.bf16.mxu0 %v6208_v6  ;;  %v2443_v35 = vsel %vm2440_vm0, %v2435_v7, %v2437_v12 }
 0x10a   : > { %5672 = vmatmul.mubr.msk.bf16.vlgmr.msra.gmra.mrb[0].mxu1 %vm325_vm2, %v6165_v48  ;;  %5684 = vmatprep.subr.msk.bf16.mxu0 %vm329_vm1, %v2135_v20  ;;  %v2439_v5 = vpop.permute.xlu0 %2438  ;;  %v2455_v40 = vsel %vm329_vm1, %v2443_v35, 0 }
 0x10b   : > { %2048 = vmatpush1.bf16.msra.mxu1 %v1999_v53  ;;  %2079 = vmatprep.mubr.bf16.mxu1 %v6208_v6  ;;  %v2444_v30 = vsel %vm2440_vm0, %v2437_v12, %v2439_v5  ;;  %v6174_v5 = vld [vmem:[%s7046_s2 + $0x88] sm:$0xff]   ;;  %vm4537_vm0 = vcmask 719872  }
 0x10c   : > { %5686 = vmatprep.subr.msk.bf16.mxu1 %vm329_vm1, %v2132_v19  ;;  %4381 = vrot.lane.b32.xlu0 %v6630_v44, %s6235_s11  ;;  %v2591_v26 = vpop.permute.xlu1 %2590 }
 0x10d   : > { %4383 = vrot.lane.b32.xlu1 %v6639_v47, %s6235_s11 }
 0x110   : > { %4385 = vrot.lane.b32.xlu0 %v6643_v17, %s6235_s11 }
 0x111   : > { %4387 = vrot.lane.b32.xlu1 %v6652_v50, %s6235_s11 }
 0x112   : > { %v2593_v27 = vpop.permute.xlu0 %2592  ;;  %v2595_v31 = vpop.permute.xlu1 %2594 }
 0x113   : > { %v2602_v39 = vsel %vm2600_vm3, %v2593_v27, %v2595_v31  ;;  %v2601_v15 = vsel %vm2600_vm3, %v2591_v26, %v2593_v27 }
 0x114   : > { %5678 = vmatmul.mubr.msk.bf16.vlgmr.msra.gmra.mrb[0].mxu0 %vm325_vm2, %v6166_v60  ;;  %4529 = vrot.lane.b32.xlu0 %v4519_v61, %s6236_s15  ;;  %v2609_v19 = vsel %vm329_vm1, %v2601_v15, 0 }
 0x115   : > { %2153 = vmatpush1.bf16.msra.mxu0 %v2141_v2  ;;  %2184 = vmatprep.mubr.bf16.mxu0 %v6208_v6 }
 0x116   : > { %5680 = vmatmul.mubr.msk.bf16.vlgmr.msra.gmra.mrb[0].mxu1 %vm325_vm2, %v6166_v60  ;;  %5691 = vmatprep.subr.msk.bf16.mxu0 %vm329_vm1, %v2283_v11  ;;  %v2597_v32 = vpop.permute.xlu0 %2596 }
 0x117   : > { %2196 = vmatpush1.bf16.msra.mxu1 %v2147_v4  ;;  %2227 = vmatprep.mubr.bf16.mxu1 %v6208_v6  ;;  %v2599_v37 = vpop.permute.xlu1 %2598  ;;  %v2603_v48 = vsel %vm2600_vm3, %v2595_v31, %v2597_v32 }
 0x118   : > { %5693 = vmatprep.subr.msk.bf16.mxu1 %vm329_vm1, %v2280_v57  ;;  %4533 = vrot.lane.b32.xlu0 %v4526_v9, %s6236_s15  ;;  %v2604_v41 = vsel %vm2600_vm3, %v2597_v32, %v2599_v37  ;;  %v2615_v52 = vsel %vm329_vm1, %v2603_v48, 0  ;;  %v6176_v32 = vld [vmem:[%s7046_s2 + $0x90] sm:$0xff]   ;;  %vm4685_vm3 = vcmask 621568  }
 0x119   : > { %4531 = vrot.lane.b32.xlu1 %v4527_v14, %s6236_s15 }
 0x11a   : > { %v2751_v38 = vpop.permute.xlu0 %2750 }
 0x11c   : > { %4677 = vrot.lane.b32.xlu0 %v4519_v61, %s6237_s19  ;;  %v2753_v43 = vpop.permute.xlu1 %2752 }
 0x11d   : > { %4535 = vrot.lane.b32.xlu1 %v4528_v21, %s6236_s15  ;;  %v2761_v55 = vsel %vm2760_vm4, %v2751_v38, %v2753_v43 }
 0x11e   : > { %v2755_v45 = vpop.permute.xlu0 %2754  ;;  %v2769_v59 = vsel %vm329_vm1, %v2761_v55, 0 }
 0x11f   : > { %v2762_v51 = vsel %vm2760_vm4, %v2753_v43, %v2755_v45 }
 0x120   : > { %5685 = vmatmul.mubr.msk.bf16.vlgmr.msra.gmra.mrb[0].mxu0 %vm325_vm2, %v6168_v24  ;;  %4681 = vrot.lane.b32.xlu0 %v4526_v9, %s6237_s19  ;;  %v2757_v18 = vpop.permute.xlu1 %2756 }
 0x121   : > { %2301 = vmatpush1.bf16.msra.mxu0 %v2289_v25  ;;  %2332 = vmatprep.mubr.bf16.mxu0 %v6208_v6  ;;  %v2763_v58 = vsel %vm2760_vm4, %v2755_v45, %v2757_v18 }
 0x122   : > { %5687 = vmatmul.mubr.msk.bf16.vlgmr.msra.gmra.mrb[0].mxu1 %vm325_vm2, %v6168_v24  ;;  %5699 = vmatprep.subr.msk.bf16.mxu0 %vm329_vm1, %v2442_v28  ;;  %v2759_v49 = vpop.permute.xlu0 %2758 }
 0x123   : > { %2344 = vmatpush1.bf16.msra.mxu1 %v2295_v29  ;;  %2375 = vmatprep.mubr.bf16.mxu1 %v6208_v6  ;;  %v2764_v20 = vsel %vm2760_vm4, %v2757_v18, %v2759_v49  ;;  %vm4844_vm4 = vcmask 392192  }
 0x124   : > { %5701 = vmatprep.subr.msk.bf16.mxu1 %vm329_vm1, %v2444_v30  ;;  %4679 = vrot.lane.b32.xlu1 %v4527_v14, %s6237_s19  ;;  %v2902_v53 = vpop.permute.xlu1 %2901 }
 0x125   : > { %4834 = vrot.lane.b32.xlu0 %v6566_v1, %s6238_s20 }
 0x126   : > { %v2904_v54 = vpop.permute.xlu0 %2903 }
 0x127   : > { %v2910_v2 = vsel %vm2909_vm5, %v2902_v53, %v2904_v54 }
 0x128   : > { %4683 = vrot.lane.b32.xlu1 %v4528_v21, %s6237_s19  ;;  %v2917_v11 = vsel %vm329_vm1, %v2910_v2, 0 }
 0x129   : > { %4838 = vrot.lane.b32.xlu0 %v6576_v10, %s6238_s20 }
 0x12a   : > { %v2906_v57 = vpop.permute.xlu1 %2905 }
 0x12b   : > { %v2911_v60 = vsel %vm2909_vm5, %v2904_v54, %v2906_v57  ;;  %v2908_v61 = vpop.permute.xlu0 %2907 }
 0x12c   : > { %5692 = vmatmul.mubr.msk.bf16.vlgmr.msra.gmra.mrb[0].mxu0 %vm325_vm2, %v6169_v34  ;;  %4836 = vrot.lane.b32.xlu1 %v6582_v16, %s6238_s20  ;;  %v2912_v8 = vsel %vm2909_vm5, %v2906_v57, %v2908_v61  ;;  %vm5004_vm5 = vcmask 343040  }
 0x12d   : > { %2461 = vmatpush1.bf16.msra.mxu0 %v2449_v36  ;;  %2492 = vmatprep.mubr.bf16.mxu0 %v6208_v6 }
 0x12e   : > { %5694 = vmatmul.mubr.msk.bf16.vlgmr.msra.gmra.mrb[0].mxu1 %vm325_vm2, %v6169_v34  ;;  %5707 = vmatprep.subr.msk.bf16.mxu0 %vm329_vm1, %v2602_v39  ;;  %v3050_v62 = vpop.permute.xlu1 %3049 }
 0x12f   : > { %2504 = vmatpush1.bf16.msra.mxu1 %v2455_v40  ;;  %2535 = vmatprep.mubr.bf16.mxu1 %v6208_v6 }
 0x130   : > { %5709 = vmatprep.subr.msk.bf16.mxu1 %vm329_vm1, %v2604_v41  ;;  %4842 = vrot.lane.b32.xlu0 %v5814_v42, %s6238_s20 }
 0x131   : > { %4840 = vrot.lane.b32.xlu1 %v6592_v22, %s6238_s20  ;;  %s6241_s20 = smov 32  }
 0x132   : > { %v3054_v63 = vpop.permute.xlu1 %3053 }
 0x134   : > { %4996 = vrot.lane.b32.xlu0 %v6582_v16, %s6239_s26 }
 0x135   : > { %4994 = vrot.lane.b32.xlu1 %v6566_v1, %s6239_s26 }
 0x137   : > { %v3207_v7 = vpop.permute.xlu1 %3206 }
 0x138   : > { %5700 = vmatmul.mubr.msk.bf16.vlgmr.msra.gmra.mrb[0].mxu0 %vm325_vm2, %v6170_v46  ;;  %5000 = vrot.lane.b32.xlu0 %v6592_v22, %s6239_s26 }
 0x139   : > { %2621 = vmatpush1.bf16.msra.mxu0 %v2609_v19  ;;  %2652 = vmatprep.mubr.bf16.mxu0 %v6208_v6 }
 0x13a   : > { %5702 = vmatmul.mubr.msk.bf16.vlgmr.msra.gmra.mrb[0].mxu1 %vm325_vm2, %v6170_v46  ;;  %5715 = vmatprep.subr.msk.bf16.mxu0 %vm329_vm1, %v2762_v51 }
 0x13b   : > { %2664 = vmatpush1.bf16.msra.mxu1 %v2615_v52  ;;  %2695 = vmatprep.mubr.bf16.mxu1 %v6208_v6  ;;  %v3211_v12 = vpop.permute.xlu1 %3210  ;;  %v6178_v52 = vld [vmem:[%s7046_s2 + $0xa0] sm:$0xff]  }
 0x13c   : > { %5717 = vmatprep.subr.msk.bf16.mxu1 %vm329_vm1, %v2764_v20  ;;  %4998 = vrot.lane.b32.xlu1 %v6576_v10, %s6239_s26 }
 0x13d   : > { %5154 = vrot.lane.b32.xlu0 %v6566_v1, %s6240_s28  ;;  %v2775_v1 = vsel %vm329_vm1, %v2763_v58, 0 }
 0x140   : > { %5002 = vrot.lane.b32.xlu1 %v5814_v42, %s6239_s26  ;;  %s6247_s26 = smov 68  }
 0x141   : > { %5158 = vrot.lane.b32.xlu0 %v6576_v10, %s6240_s28  ;;  %v3052_v10 = vpop.permute.xlu0 %3051 }
 0x142   : > { %v3059_v9 = vsel %vm3057_vm6, %v3052_v10, %v3054_v63  ;;  %v3058_v21 = vsel %vm3057_vm6, %v3050_v62, %v3052_v10  ;;  %v3215_v25 = vpop.permute.xlu1 %3214 }
 0x143   : > { %v3065_v13 = vsel %vm329_vm1, %v3058_v21, 0 }
 0x144   : > { %5708 = vmatmul.mubr.msk.bf16.vlgmr.msra.gmra.mrb[0].mxu0 %vm325_vm2, %v6171_v56  ;;  %5156 = vrot.lane.b32.xlu1 %v6582_v16, %s6240_s28  ;;  %v6173_v16 = vld [vmem:[%s7046_s2 + $0x80] sm:$0xff]  }
 0x145   : > { %2781 = vmatpush1.bf16.msra.mxu0 %v2769_v59  ;;  %2812 = vmatprep.mubr.bf16.mxu0 %v6208_v6  ;;  %v3056_v4 = vpop.permute.xlu0 %3055 }
 0x146   : > { %5710 = vmatmul.mubr.msk.bf16.vlgmr.msra.gmra.mrb[0].mxu1 %vm325_vm2, %v6171_v56  ;;  %5722 = vmatprep.subr.msk.bf16.mxu0 %vm329_vm1, %v2911_v60  ;;  %v3060_v24 = vsel %vm3057_vm6, %v3054_v63, %v3056_v4  ;;  %v3360_v31 = vpop.permute.xlu1 %3359  ;;  %vm5164_vm6 = vcmask 293888  }
 0x147   : > { %2824 = vmatpush1.bf16.msra.mxu1 %v2775_v1  ;;  %2855 = vmatprep.mubr.bf16.mxu1 %v6208_v6  ;;  %v3071_v27 = vsel %vm329_vm1, %v3060_v24, 0  ;;  %v6179_v1 = vld [vmem:[%s7046_s2 + $0xa8] sm:$0xff]  }
 0x148   : > { %5724 = vmatprep.subr.msk.bf16.mxu1 %vm329_vm1, %v2908_v61  ;;  %5162 = vrot.lane.b32.xlu0 %v5814_v42, %s6240_s28  ;;  %v6177_v42 = vld [vmem:[%s7046_s2 + $0x98] sm:$0xff]  }
 0x149   : > { %5160 = vrot.lane.b32.xlu1 %v6592_v22, %s6240_s28  ;;  %v2923_v22 = vsel %vm329_vm1, %v2912_v8, 0  ;;  %v3209_v14 = vpop.permute.xlu0 %3208  ;;  %s6248_s28 = smov 100  }
 0x14a   : > { %v3218_v26 = vsel %vm3216_vm7, %v3209_v14, %v3211_v12  ;;  %v3217_v30 = vsel %vm3216_vm7, %v3207_v7, %v3209_v14  ;;  %v3364_v38 = vpop.permute.xlu1 %3363 }
 0x14b   : > { %v3225_v35 = vsel %vm329_vm1, %v3217_v30, 0 }
 0x14d   : > { %v3213_v23 = vpop.permute.xlu0 %3212 }
 0x14e   : > { %v3220_v28 = vsel %vm3216_vm7, %v3213_v23, %v3215_v25  ;;  %v3219_v34 = vsel %vm3216_vm7, %v3211_v12, %v3213_v23  ;;  %v5306_v12 = vld [vmem:[%s7048_s4] sm:$0xff]  ;;  %v5307_v25 = vld [vmem:[%s7048_s4 + $0x8] sm:$0xff]  ;;  %vm5410_vm7 = vcmask 130048  }
 0x14f   : > { %v3231_v37 = vsel %vm329_vm1, %v3219_v34, 0  ;;  %v3508_v41 = vpop.permute.xlu1 %3507 }
 0x150   : > { %5716 = vmatmul.mubr.msk.bf16.vlgmr.msra.gmra.mrb[0].mxu0 %vm325_vm2, %v6173_v16 }
 0x151   : > { %2929 = vmatpush1.bf16.msra.mxu0 %v2917_v11  ;;  %2960 = vmatprep.mubr.bf16.mxu0 %v6208_v6  ;;  %v3358_v29 = vpop.permute.xlu0 %3357  ;;  %v5278_v11 = vld [vmem:[%s7047_s3] sm:$0xff] }
 0x152   : > { %5718 = vmatmul.mubr.msk.bf16.vlgmr.msra.gmra.mrb[0].mxu1 %vm325_vm2, %v6173_v16  ;;  %5729 = vmatprep.subr.msk.bf16.mxu0 %vm329_vm1, %v3059_v9  ;;  %v3366_v40 = vsel %vm3365_vm8, %v3358_v29, %v3360_v31 }
 0x153   : > { %2972 = vmatpush1.bf16.msra.mxu1 %v2923_v22  ;;  %3003 = vmatprep.mubr.bf16.mxu1 %v6208_v6  ;;  %v3373_v15 = vsel %vm329_vm1, %v3366_v40, 0  ;;  %v3512_v48 = vpop.permute.xlu1 %3511  ;;  %v6180_v22 = vld [vmem:[%s7046_s2 + $0xb0] sm:$0xff]  }
 0x154   : > { %5731 = vmatprep.subr.msk.bf16.mxu1 %vm329_vm1, %v3056_v4  ;;  %v5279_v4 = vld [vmem:[%s7047_s3 + $0x8] sm:$0xff]  ;;  %5282 = vperm.xlu1 %6151, %v5278_v11  }
 0x155   : > { %v3362_v33 = vpop.permute.xlu0 %3361  ;;  %5287 = vperm.xlu0 %6152, %v5279_v4   ;;  %v6186_v4 = vld [vmem:[%s7046_s2 + $0xe0] sm:$0xff]  }
 0x156   : > { %v3367_v36 = vsel %vm3365_vm8, %v3360_v31, %v3362_v33  ;;  %v3368_v45 = vsel %vm3365_vm8, %v3362_v33, %v3364_v38  ;;  %v6182_v33 = vld [vmem:[%s7046_s2 + $0xc0] sm:$0xff]   ;;  %vm5412_vm8 = vcmask 261120  }
 0x157   : > { %v3379_v18 = vsel %vm329_vm1, %v3368_v45, 0 }
 0x158   : > { %5310 = vperm.xlu1 %6151, %v5306_v12  }
 0x159   : > { %v3506_v39 = vpop.permute.xlu0 %3505 }
 0x15a   : > { %v3514_v49 = vsel %vm3513_vm9, %v3506_v39, %v3508_v41 }
 0x15b   : > { %v3656_v51 = vpop.permute.xlu1 %3655  ;;  %v3521_v54 = vsel %vm329_vm1, %v3514_v49, 0 }
 0x15c   : > { %5723 = vmatmul.mubr.msk.bf16.vlgmr.msra.gmra.mrb[0].mxu0 %vm325_vm2, %v6174_v5  ;;  %5315 = vperm.xlu1 %6151, %v5307_v25   ;;  %v6187_v25 = vld [vmem:[%s7046_s2 + $0xe8] sm:$0xff]  }
 0x15d   : > { %3077 = vmatpush1.bf16.msra.mxu0 %v3065_v13  ;;  %3108 = vmatprep.mubr.bf16.mxu0 %v6208_v6  ;;  %v3510_v43 = vpop.permute.xlu0 %3509 }
 0x15e   : > { %5725 = vmatmul.mubr.msk.bf16.vlgmr.msra.gmra.mrb[0].mxu1 %vm325_vm2, %v6174_v5  ;;  %5737 = vmatprep.subr.msk.bf16.mxu0 %vm329_vm1, %v3218_v26  ;;  %v3515_v46 = vsel %vm3513_vm9, %v3508_v41, %v3510_v43  ;;  %v3516_v53 = vsel %vm3513_vm9, %v3510_v43, %v3512_v48  ;;  %vm5419_vm9 = vcmask 785408  }
 0x15f   : > { %3120 = vmatpush1.bf16.msra.mxu1 %v3071_v27  ;;  %3151 = vmatprep.mubr.bf16.mxu1 %v6208_v6  ;;  %v3527_v56 = vsel %vm329_vm1, %v3516_v53, 0  ;;  %v3660_v57 = vpop.permute.xlu1 %3659  ;;  %v6181_v27 = vld [vmem:[%s7046_s2 + $0xb8] sm:$0xff]  }
 0x160   : > { %5739 = vmatprep.subr.msk.bf16.mxu1 %vm329_vm1, %v3220_v28 }
 0x161   : > { %v3654_v19 = vpop.permute.xlu0 %3653 }
 0x162   : > { %v3662_v59 = vsel %vm3661_vm10, %v3654_v19, %v3656_v51  ;;  %v6184_v19 = vld [vmem:[%s7046_s2 + $0xd0] sm:$0xff]  }
 0x163   : > { %v3669_v10 = vsel %vm329_vm1, %v3662_v59, 0 }
 0x165   : > { %v3658_v20 = vpop.permute.xlu0 %3657 }
 0x166   : > { %v3663_v55 = vsel %vm3661_vm10, %v3656_v51, %v3658_v20  ;;  %v3804_v60 = vpop.permute.xlu1 %3803  ;;  %v3664_v62 = vsel %vm3661_vm10, %v3658_v20, %v3660_v57  ;;  %vm5421_vm10 = vcmask 916480  }
 0x167   : > { %v3675_v2 = vsel %vm329_vm1, %v3664_v62, 0 }
 0x168   : > { %5730 = vmatmul.mubr.msk.bf16.vlgmr.msra.gmra.mrb[0].mxu0 %vm325_vm2, %v6176_v32 }
 0x169   : > { %3237 = vmatpush1.bf16.msra.mxu0 %v3225_v35  ;;  %3268 = vmatprep.mubr.bf16.mxu0 %v6208_v6  ;;  %v3802_v58 = vpop.permute.xlu0 %3801  ;;  %v4101_v35 = vsel %vm329_vm1, %v6630_v44, 0 }
 0x16a   : > { %5732 = vmatmul.mubr.msk.bf16.vlgmr.msra.gmra.mrb[0].mxu1 %vm325_vm2, %v6176_v32  ;;  %5744 = vmatprep.subr.msk.bf16.mxu0 %vm329_vm1, %v3367_v36  ;;  %v3808_v16 = vpop.permute.xlu1 %3807  ;;  %v3810_v7 = vsel %vm3809_vm11, %v3802_v58, %v3804_v60 }
 0x16b   : > { %3280 = vmatpush1.bf16.msra.mxu1 %v3231_v37  ;;  %3311 = vmatprep.mubr.bf16.mxu1 %v6208_v6  ;;  %v3817_v5 = vsel %vm329_vm1, %v3810_v7, 0 }
 0x16c   : > { %5746 = vmatprep.subr.msk.bf16.mxu1 %vm329_vm1, %v3364_v38 }
 0x16d   : > { %v3806_v61 = vpop.permute.xlu0 %3805 }
 0x16e   : > { %v3811_v63 = vsel %vm3809_vm11, %v3804_v60, %v3806_v61  ;;  %v3952_v9 = vpop.permute.xlu1 %3951  ;;  %v3812_v21 = vsel %vm3809_vm11, %v3806_v61, %v3808_v16  ;;  %v6185_v60 = vld [vmem:[%s7046_s2 + $0xd8] sm:$0xff]  }
 0x16f   : > { %v3823_v24 = vsel %vm329_vm1, %v3812_v21, 0 }
 0x171   : > { %v3950_v8 = vpop.permute.xlu0 %3949 }
 0x172   : > { %v3956_v13 = vpop.permute.xlu1 %3955  ;;  %v3958_v26 = vsel %vm3957_vm12, %v3950_v8, %v3952_v9 }
 0x173   : > { %v3965_v29 = vsel %vm329_vm1, %v3958_v26, 0 }
 0x174   : > { %5738 = vmatmul.mubr.msk.bf16.vlgmr.msra.gmra.mrb[0].mxu0 %vm325_vm2, %v6177_v42 }
 0x175   : > { %3385 = vmatpush1.bf16.msra.mxu0 %v3373_v15  ;;  %3416 = vmatprep.mubr.bf16.mxu0 %v6208_v6  ;;  %v3954_v14 = vpop.permute.xlu0 %3953 }
 0x176   : > { %5740 = vmatmul.mubr.msk.bf16.vlgmr.msra.gmra.mrb[0].mxu1 %vm325_vm2, %v6177_v42  ;;  %5751 = vmatprep.subr.msk.bf16.mxu0 %vm329_vm1, %v3515_v46  ;;  %v3959_v23 = vsel %vm3957_vm12, %v3952_v9, %v3954_v14  ;;  %v3960_v28 = vsel %vm3957_vm12, %v3954_v14, %v3956_v13  ;;  %v4236_v32 = vpop.permute.xlu1 %4235 }
 0x177   : > { %3428 = vmatpush1.bf16.msra.mxu1 %v3379_v18  ;;  %3459 = vmatprep.mubr.bf16.mxu1 %v6208_v6  ;;  %v3971_v30 = vsel %vm329_vm1, %v3960_v28, 0 }
 0x178   : > { %5753 = vmatprep.subr.msk.bf16.mxu1 %vm329_vm1, %v3512_v48 }
 0x179   : > { %v4234_v31 = vpop.permute.xlu0 %4233 }
 0x17a   : > { %v4240_v37 = vpop.permute.xlu1 %4239  ;;  %v4242_v39 = vsel %vm4241_vm13, %v4234_v31, %v4236_v32 }
 0x17b   : > { %v4249_v41 = vsel %vm329_vm1, %v4242_v39, 0 }
 0x17d   : > { %v4238_v34 = vpop.permute.xlu0 %4237 }
 0x17e   : > { %v4243_v36 = vsel %vm4241_vm13, %v4236_v32, %v4238_v34  ;;  %v4244_v40 = vsel %vm4241_vm13, %v4238_v34, %v4240_v37 }
 0x17f   : > { %v4384_v44 = vpop.permute.xlu1 %4383  ;;  %v4255_v15 = vsel %vm329_vm1, %v4244_v40, 0 }
 0x180   : > { %5745 = vmatmul.mubr.msk.bf16.vlgmr.msra.gmra.mrb[0].mxu0 %vm325_vm2, %v6178_v52 }
 0x181   : > { %3533 = vmatpush1.bf16.msra.mxu0 %v3521_v54  ;;  %3564 = vmatprep.mubr.bf16.mxu0 %v6208_v6  ;;  %v4382_v38 = vpop.permute.xlu0 %4381 }
 0x182   : > { %5747 = vmatmul.mubr.msk.bf16.vlgmr.msra.gmra.mrb[0].mxu1 %vm325_vm2, %v6178_v52  ;;  %5758 = vmatprep.subr.msk.bf16.mxu0 %vm329_vm1, %v3663_v55  ;;  %v4390_v48 = vsel %vm4389_vm14, %v4382_v38, %v4384_v44 }
 0x183   : > { %3576 = vmatpush1.bf16.msra.mxu1 %v3527_v56  ;;  %3607 = vmatprep.mubr.bf16.mxu1 %v6208_v6  ;;  %v4388_v42 = vpop.permute.xlu1 %4387  ;;  %v4397_v20 = vsel %vm329_vm1, %v4390_v48, 0 }
 0x184   : > { %5760 = vmatprep.subr.msk.bf16.mxu1 %vm329_vm1, %v3660_v57 }
 0x18b   : > { %v4532_v46 = vpop.permute.xlu1 %4531 }
 0x18c   : > { %5752 = vmatmul.mubr.msk.bf16.vlgmr.msra.gmra.mrb[0].mxu0 %vm325_vm2, %v6179_v1 }
 0x18d   : > { %3681 = vmatpush1.bf16.msra.mxu0 %v3669_v10  ;;  %3712 = vmatprep.mubr.bf16.mxu0 %v6208_v6 }
 0x18e   : > { %5754 = vmatmul.mubr.msk.bf16.vlgmr.msra.gmra.mrb[0].mxu1 %vm325_vm2, %v6179_v1  ;;  %5765 = vmatprep.subr.msk.bf16.mxu0 %vm329_vm1, %v3811_v63 }
 0x18f   : > { %3724 = vmatpush1.bf16.msra.mxu1 %v3675_v2  ;;  %3755 = vmatprep.mubr.bf16.mxu1 %v6208_v6  ;;  %v4536_v49 = vpop.permute.xlu1 %4535 }
 0x190   : > { %5767 = vmatprep.subr.msk.bf16.mxu1 %vm329_vm1, %v3808_v16 }
 0x196   : > { %v4680_v55 = vpop.permute.xlu1 %4679 }
 0x198   : > { %5759 = vmatmul.mubr.msk.bf16.vlgmr.msra.gmra.mrb[0].mxu0 %vm325_vm2, %v6180_v22 }
 0x199   : > { %3829 = vmatpush1.bf16.msra.mxu0 %v3817_v5  ;;  %3860 = vmatprep.mubr.bf16.mxu0 %v6208_v6 }
 0x19a   : > { %5761 = vmatmul.mubr.msk.bf16.vlgmr.msra.gmra.mrb[0].mxu1 %vm325_vm2, %v6180_v22  ;;  %5772 = vmatprep.subr.msk.bf16.mxu0 %vm329_vm1, %v3959_v23  ;;  %v4684_v57 = vpop.permute.xlu1 %4683 }
 0x19b   : > { %3872 = vmatpush1.bf16.msra.mxu1 %v3823_v24  ;;  %3903 = vmatprep.mubr.bf16.mxu1 %v6208_v6 }
 0x19c   : > { %5774 = vmatprep.subr.msk.bf16.mxu1 %vm329_vm1, %v3956_v13 }
 0x19e   : > { %v4837_v62 = vpop.permute.xlu1 %4836 }
 0x1a3   : > { %v4841_v16 = vpop.permute.xlu1 %4840 }
 0x1a4   : > { %5766 = vmatmul.mubr.msk.bf16.vlgmr.msra.gmra.mrb[0].mxu0 %vm325_vm2, %v6181_v27 }
 0x1a5   : > { %3977 = vmatpush1.bf16.msra.mxu0 %v3965_v29  ;;  %4008 = vmatprep.mubr.bf16.mxu0 %v6208_v6 }
 0x1a6   : > { %5768 = vmatmul.mubr.msk.bf16.vlgmr.msra.gmra.mrb[0].mxu1 %vm325_vm2, %v6181_v27  ;;  %5779 = vmatprep.subr.msk.bf16.mxu0 %vm329_vm1, %v6639_v47  ;;  %v4107_v47 = vsel %vm329_vm1, %v6643_v17, 0  ;;  %v6183_v17 = vld [vmem:[%s7046_s2 + $0xc8] sm:$0xff]  }
 0x1a7   : > { %4020 = vmatpush1.bf16.msra.mxu1 %v3971_v30  ;;  %4051 = vmatprep.mubr.bf16.mxu1 %v6208_v6  ;;  %v4995_v22 = vpop.permute.xlu1 %4994 }
 0x1a8   : > { %5781 = vmatprep.subr.msk.bf16.mxu1 %vm329_vm1, %v6652_v50  ;;  %v4386_v50 = vpop.permute.xlu0 %4385 }
 0x1a9   : > { %v4391_v45 = vsel %vm4389_vm14, %v4384_v44, %v4386_v50  ;;  %v4392_v52 = vsel %vm4389_vm14, %v4386_v50, %v4388_v42 }
 0x1aa   : > { %v4403_v54 = vsel %vm329_vm1, %v4392_v52, 0 }
 0x1ac   : > { %v4530_v43 = vpop.permute.xlu0 %4529 }
 0x1ad   : > { %v4538_v59 = vsel %vm4537_vm0, %v4530_v43, %v4532_v46 }
 0x1ae   : > { %v4545_v61 = vsel %vm329_vm1, %v4538_v59, 0  ;;  %v4999_v23 = vpop.permute.xlu1 %4998 }
 0x1b0   : > { %5773 = vmatmul.mubr.msk.bf16.vlgmr.msra.gmra.mrb[0].mxu0 %vm325_vm2, %v6182_v33  ;;  %v4534_v18 = vpop.permute.xlu0 %4533 }
 0x1b1   : > { %4113 = vmatpush1.bf16.msra.mxu0 %v4101_v35  ;;  %4144 = vmatprep.mubr.bf16.mxu0 %v6208_v6  ;;  %v4539_v53 = vsel %vm4537_vm0, %v4532_v46, %v4534_v18  ;;  %v4540_v1 = vsel %vm4537_vm0, %v4534_v18, %v4536_v49 }
 0x1b2   : > { %5775 = vmatmul.mubr.msk.bf16.vlgmr.msra.gmra.mrb[0].mxu1 %vm325_vm2, %v6182_v33  ;;  %5786 = vmatprep.subr.msk.bf16.mxu0 %vm329_vm1, %v4243_v36  ;;  %v4551_v63 = vsel %vm329_vm1, %v4540_v1, 0  ;;  %v5003_v28 = vpop.permute.xlu1 %5002  ;;  %v6188_v36 = vld [vmem:[%s7046_s2 + $0xf0] sm:$0xff]  }
 0x1b3   : > { %4156 = vmatpush1.bf16.msra.mxu1 %v4107_v47  ;;  %4187 = vmatprep.mubr.bf16.mxu1 %v6208_v6 }
 0x1b4   : > { %5788 = vmatprep.subr.msk.bf16.mxu1 %vm329_vm1, %v4240_v37  ;;  %v4678_v51 = vpop.permute.xlu0 %4677 }
 0x1b5   : > { %v4686_v11 = vsel %vm4685_vm3, %v4678_v51, %v4680_v55 }
 0x1b6   : > { %v4693_v9 = vsel %vm329_vm1, %v4686_v11, 0  ;;  %v5157_v34 = vpop.permute.xlu1 %5156 }
 0x1b8   : > { %v4682_v56 = vpop.permute.xlu0 %4681 }
 0x1b9   : > { %v4687_v10 = vsel %vm4685_vm3, %v4680_v55, %v4682_v56  ;;  %v4688_v7 = vsel %vm4685_vm3, %v4682_v56, %v4684_v57 }
 0x1ba   : > { %v4699_v21 = vsel %vm329_vm1, %v4688_v7, 0 }
 0x1bb   : > { %v5161_v44 = vpop.permute.xlu1 %5160 }
 0x1bc   : > { %5780 = vmatmul.mubr.msk.bf16.vlgmr.msra.gmra.mrb[0].mxu0 %vm325_vm2, %v6183_v17  ;;  %v4835_v58 = vpop.permute.xlu0 %4834 }
 0x1bd   : > { %4261 = vmatpush1.bf16.msra.mxu0 %v4249_v41  ;;  %4292 = vmatprep.mubr.bf16.mxu0 %v6208_v6  ;;  %v4845_v13 = vsel %vm4844_vm4, %v4835_v58, %v4837_v62  ;;  %v6189_v41 = vld [vmem:[%s7046_s2 + $0xf8] sm:$0xff]  }
 0x1be   : > { %5782 = vmatmul.mubr.msk.bf16.vlgmr.msra.gmra.mrb[0].mxu1 %vm325_vm2, %v6183_v17  ;;  %5793 = vmatprep.subr.msk.bf16.mxu0 %vm329_vm1, %v4391_v45  ;;  %v4853_v27 = vsel %vm329_vm1, %v4845_v13, 0 }
 0x1bf   : > { %4304 = vmatpush1.bf16.msra.mxu1 %v4255_v15  ;;  %4335 = vmatprep.mubr.bf16.mxu1 %v6208_v6  ;;  %v6190_v15 = vld [vmem:[%s7046_s2 + $0x100] sm:$0xff]  }
 0x1c0   : > { %5795 = vmatprep.subr.msk.bf16.mxu1 %vm329_vm1, %v4388_v42  ;;  %v4839_v2 = vpop.permute.xlu0 %4838 }
 0x1c1   : > { %v4846_v12 = vsel %vm4844_vm4, %v4837_v62, %v4839_v2  ;;  %v4847_v26 = vsel %vm4844_vm4, %v4839_v2, %v4841_v16 }
 0x1c2   : > { %v4859_v31 = vsel %vm329_vm1, %v4847_v26, 0 }
 0x1c4   : > { %v4843_v8 = vpop.permute.xlu0 %4842 }
 0x1c5   : > { %v4848_v5 = vsel %vm4844_vm4, %v4841_v16, %v4843_v8 }
 0x1c8   : > { %5787 = vmatmul.mubr.msk.bf16.vlgmr.msra.gmra.mrb[0].mxu0 %vm325_vm2, %v6184_v19  ;;  %v4997_v14 = vpop.permute.xlu0 %4996 }
 0x1c9   : > { %4409 = vmatpush1.bf16.msra.mxu0 %v4397_v20  ;;  %4440 = vmatprep.mubr.bf16.mxu0 %v6208_v6  ;;  %v5006_v30 = vsel %vm5004_vm5, %v4997_v14, %v4999_v23  ;;  %v5005_v35 = vsel %vm5004_vm5, %v4995_v22, %v4997_v14 }
 0x1ca   : > { %5789 = vmatmul.mubr.msk.bf16.vlgmr.msra.gmra.mrb[0].mxu1 %vm325_vm2, %v6184_v19  ;;  %5800 = vmatprep.subr.msk.bf16.mxu0 %vm329_vm1, %v4539_v53  ;;  %v5013_v37 = vsel %vm329_vm1, %v5005_v35, 0 }
 0x1cb   : > { %4452 = vmatpush1.bf16.msra.mxu1 %v4403_v54  ;;  %4483 = vmatprep.mubr.bf16.mxu1 %v6208_v6 }
 0x1cc   : > { %5802 = vmatprep.subr.msk.bf16.mxu1 %vm329_vm1, %v4536_v49  ;;  %v5001_v24 = vpop.permute.xlu0 %5000 }
 0x1cd   : > { %v5008_v32 = vsel %vm5004_vm5, %v5001_v24, %v5003_v28  ;;  %v5007_v47 = vsel %vm5004_vm5, %v4999_v23, %v5001_v24 }
 0x1ce   : > { %v5019_v39 = vsel %vm329_vm1, %v5007_v47, 0 }
 0x1d0   : > { %v5155_v29 = vpop.permute.xlu0 %5154 }
 0x1d1   : > { %v5165_v40 = vsel %vm5164_vm6, %v5155_v29, %v5157_v34 }
 0x1d2   : > { %v5173_v43 = vsel %vm329_vm1, %v5165_v40, 0 }
 0x1d3   : > { %v5283_v46 = vpop.permute.xlu1 %5282 }
 0x1d4   : > { %5794 = vmatmul.mubr.msk.bf16.vlgmr.msra.gmra.mrb[0].mxu0 %vm325_vm2, %v6185_v60  ;;  %v5159_v33 = vpop.permute.xlu0 %5158 }
 0x1d5   : > { %4557 = vmatpush1.bf16.msra.mxu0 %v4545_v61  ;;  %4588 = vmatprep.mubr.bf16.mxu0 %v6208_v6  ;;  %v5166_v50 = vsel %vm5164_vm6, %v5157_v34, %v5159_v33  ;;  %v5167_v42 = vsel %vm5164_vm6, %v5159_v33, %v5161_v44 }
 0x1d6   : > { %5796 = vmatmul.mubr.msk.bf16.vlgmr.msra.gmra.mrb[0].mxu1 %vm325_vm2, %v6185_v60  ;;  %5807 = vmatprep.subr.msk.bf16.mxu0 %vm329_vm1, %v4687_v10  ;;  %v5179_v45 = vsel %vm329_vm1, %v5167_v42, 0 }
 0x1d7   : > { %4600 = vmatpush1.bf16.msra.mxu1 %v4551_v63  ;;  %4631 = vmatprep.mubr.bf16.mxu1 %v6208_v6  ;;  %v5311_v18 = vpop.permute.xlu1 %5310 }
 0x1d8   : > { %5809 = vmatprep.subr.msk.bf16.mxu1 %vm329_vm1, %v4684_v57  ;;  %v5163_v38 = vpop.permute.xlu0 %5162 }
 0x1d9   : > { %v5168_v17 = vsel %vm5164_vm6, %v5161_v44, %v5163_v38 }
 0x1db   : > { %v5316_v8 = vpop.permute.xlu1 %5315 }
 0x1dc   : > { %v5288_v19 = vpop.permute.xlu0 %5287 }
 0x1e0   : > { %5801 = vmatmul.mubr.msk.bf16.vlgmr.msra.gmra.mrb[0].mxu0 %vm325_vm2, %v6186_v4 }
 0x1e1   : > { %4705 = vmatpush1.bf16.msra.mxu0 %v4693_v9  ;;  %4736 = vmatprep.mubr.bf16.mxu0 %v6208_v6 }
 0x1e2   : > { %5803 = vmatmul.mubr.msk.bf16.vlgmr.msra.gmra.mrb[0].mxu1 %vm325_vm2, %v6186_v4  ;;  %5815 = vmatprep.subr.msk.bf16.mxu0 %vm329_vm1, %v4846_v12 }
 0x1e3   : > { %4748 = vmatpush1.bf16.msra.mxu1 %v4699_v21  ;;  %4779 = vmatprep.mubr.bf16.mxu1 %v6208_v6 }
 0x1e4   : > { %5817 = vmatprep.subr.msk.bf16.mxu1 %vm329_vm1, %v4848_v5 }
 0x1ec   : > { %5808 = vmatmul.mubr.msk.bf16.vlgmr.msra.gmra.mrb[0].mxu0 %vm325_vm2, %v6187_v25 }
 0x1ed   : > { %4865 = vmatpush1.bf16.msra.mxu0 %v4853_v27  ;;  %4896 = vmatprep.mubr.bf16.mxu0 %v6208_v6 }
 0x1ee   : > { %5810 = vmatmul.mubr.msk.bf16.vlgmr.msra.gmra.mrb[0].mxu1 %vm325_vm2, %v6187_v25  ;;  %5823 = vmatprep.subr.msk.bf16.mxu0 %vm329_vm1, %v5006_v30 }
 0x1ef   : > { %4908 = vmatpush1.bf16.msra.mxu1 %v4859_v31  ;;  %4939 = vmatprep.mubr.bf16.mxu1 %v6208_v6 }
 0x1f0   : > { %5825 = vmatprep.subr.msk.bf16.mxu1 %vm329_vm1, %v5008_v32 }
 0x1f8   : > { %5816 = vmatmul.mubr.msk.bf16.vlgmr.msra.gmra.mrb[0].mxu0 %vm325_vm2, %v6188_v36 }
 0x1f9   : > { %5025 = vmatpush1.bf16.msra.mxu0 %v5013_v37  ;;  %5056 = vmatprep.mubr.bf16.mxu0 %v6208_v6 }
 0x1fa   : > { %5818 = vmatmul.mubr.msk.bf16.vlgmr.msra.gmra.mrb[0].mxu1 %vm325_vm2, %v6188_v36  ;;  %5831 = vmatprep.subr.msk.bf16.mxu0 %vm329_vm1, %v5166_v50 }
 0x1fb   : > { %5068 = vmatpush1.bf16.msra.mxu1 %v5019_v39  ;;  %5099 = vmatprep.mubr.bf16.mxu1 %v6208_v6 }
 0x1fc   : > { %5833 = vmatprep.subr.msk.bf16.mxu1 %vm329_vm1, %v5168_v17  ;;  %vm5347_vm1 = vcmask 523264  }
 0x204   : > { %5824 = vmatmul.mubr.msk.bf16.vlgmr.msra.gmra.mrb[0].mxu0 %vm325_vm2, %v6189_v41 }
 0x205   : > { %5185 = vmatpush1.bf16.msra.mxu0 %v5173_v43  ;;  %5216 = vmatprep.mubr.bf16.mxu0 %v6208_v6 }
 0x206   : > { %5826 = vmatmul.mubr.msk.bf16.vlgmr.msra.gmra.mrb[0].mxu1 %vm325_vm2, %v6189_v41 }
 0x207   : > { %5228 = vmatpush1.bf16.msra.mxu1 %v5179_v45  ;;  %5259 = vmatprep.mubr.bf16.mxu1 %v6208_v6 }
 0x210   : > { %5832 = vmatmul.mubr.msk.bf16.vlgmr.msra.gmra.mrb[0].mxu0 %vm325_vm2, %v6190_v15 }
 0x212   : > { %5834 = vmatmul.mubr.msk.bf16.vlgmr.msra.gmra.mrb[0].mxu1 %vm325_vm2, %v6190_v15  ;;  %vm5388_vm2 = vcmask 162816  }
 0x2e3   : > { %v5218_v48 = vpop.f32.mrb[0].mxu0 }
 0x2e4   : > { %v5290_v49 = vadd.f32 %v5283_v46, %v5218_v48  ;;  %v5220_v51 = vpop.f32.mrb[1].mxu0 }
 0x2e5   : > { %v5291_v52 = vadd.f32 %v5283_v46, %v5220_v51  ;;  %v5222_v20 = vpop.f32.mrb[2].mxu0  ;;  %v5261_v53 = vpop.f32.mrb[0].mxu1 }
 0x2e6   : > { %v5298_v54 = vmax.f32 %v5290_v49, 0.0  ;;  %v5294_v55 = vadd.f32 %v5288_v19, %v5222_v20  ;;  %v5292_v6 = vadd.f32 %v5283_v46, %v5261_v53  ;;  %v5224_v56 = vpop.f32.mrb[3].mxu0  ;;  %v5263_v57 = vpop.f32.mrb[1].mxu1 }
 0x2e7   : > { %v5299_v58 = vmax.f32 %v5291_v52, 0.0  ;;  %v5295_v59 = vadd.f32 %v5288_v19, %v5224_v56  ;;  %v5293_v60 = vadd.f32 %v5283_v46, %v5263_v57  ;;  %v5265_v1 = vpop.f32.mrb[2].mxu1 }
 0x2e8   : > { %v5302_v61 = vmax.f32 %v5294_v55, 0.0  ;;  %v5300_v62 = vmax.f32 %v5292_v6, 0.0  ;;  %v5296_v10 = vadd.f32 %v5288_v19, %v5265_v1  ;;  %v5267_v63 = vpop.f32.mrb[3].mxu1  ;;  %v5318_v4 = vmul.f32 %v5311_v18, %v5298_v54 }
 0x2e9   : > { %v5303_v2 = vmax.f32 %v5295_v59, 0.0  ;;  %v5301_v16 = vmax.f32 %v5293_v60, 0.0  ;;  %v5297_v11 = vadd.f32 %v5288_v19, %v5267_v63  ;;  %v5319_v22 = vmul.f32 %v5311_v18, %v5299_v58 }
 0x2ea   : > { %v5304_v7 = vmax.f32 %v5296_v10, 0.0  ;;  %v5322_v9 = vmul.f32 %v5316_v8, %v5302_v61  ;;  %v5320_v5 = vmul.f32 %v5311_v18, %v5300_v62 }
 0x2eb   : > { %v5321_v14 = vmul.f32 %v5311_v18, %v5301_v16  ;;  %v5323_v12 = vmul.f32 %v5316_v8, %v5303_v2  ;;  %v5305_v21 = vmax.f32 %v5297_v11, 0.0 }
 0x2ec   : > { %v5324_v23 = vmul.f32 %v5316_v8, %v5304_v7  ;;  %v5326_v24 = vadd.f32 %v5322_v9, %v5318_v4 }
 0x2ed   : > { %v5333_v13 = vadd.f32 %v5323_v12, %v5319_v22  ;;  %v5325_v25 = vmul.f32 %v5316_v8, %v5305_v21  ;;  %v5348_v28 = vsel %vm5347_vm1, %v5321_v14, 0.0 }
 0x2ee   : > { %v5327_v26 = vrot.slane %v5326_v24, 4  ;;  %v5340_v27 = vadd.f32 %v5324_v23, %v5320_v5 }
 0x2ef   : > { %v5334_v29 = vrot.slane %v5333_v13, 4  ;;  %v5349_v30 = vsel %vm5347_vm1, %v5325_v25, 0.0 }
 0x2f0   : > { %v5328_v31 = vadd.f32 %v5327_v26, %v5326_v24  ;;  %v5341_v32 = vrot.slane %v5340_v27, 4  ;;  %v5350_v33 = vadd.f32 %v5349_v30, %v5348_v28 }
 0x2f1   : > { %v5335_v34 = vadd.f32 %v5334_v29, %v5333_v13 }
 0x2f2   : > { %v5329_v35 = vrot.slane %v5328_v31, 2  ;;  %v5342_v36 = vadd.f32 %v5341_v32, %v5340_v27  ;;  %v5351_v43 = vrot.slane %v5350_v33, 4 }
 0x2f3   : > { %v5336_v47 = vrot.slane %v5335_v34, 2 }
 0x2f4   : > { %v5330_v37 = vadd.f32 %v5329_v35, %v5328_v31  ;;  %v5343_v38 = vrot.slane %v5342_v36, 2  ;;  %v5352_v15 = vadd.f32 %v5351_v43, %v5350_v33  ;;  %v6251_v33 = vmov 1966171168  }
 0x2f5   : > { %v5337_v44 = vadd.f32 %v5336_v47, %v5335_v34  ;;  %v5448_v34 = vunpack.c.l.s4 %v6251_v33 }
 0x2f6   : > { %v5331_v50 = vrot.slane %v5330_v37, 1  ;;  %v5344_v39 = vadd.f32 %v5343_v38, %v5342_v36  ;;  %v5353_v46 = vrot.slane %v5352_v15, 2  ;;  %v5472_v36 = vsub.s32 0, %v6298_v3 }
 0x2f7   : > { %v5338_v17 = vrot.slane %v5337_v44, 1  ;;  %v5449_v35 = vunpack.c.0.s8 %v5448_v34 }
 0x2f8   : > { %v5332_v40 = vadd.f32 %v5331_v50, %v5330_v37  ;;  %v5345_v41 = vrot.slane %v5344_v39, 1  ;;  %v5354_v18 = vadd.f32 %v5353_v46, %v5352_v15 }
 0x2f9   : > { %v5339_v42 = vadd.f32 %v5338_v17, %v5337_v44  ;;  %v5452_v37 = vsub.s32 %v5449_v35, %v6298_v3 }
 0x2fa   : > { %5358 = vrot.lane.b32.xlu0 %v5332_v40, %s6235_s11  ;;  %v5346_v45 = vadd.f32 %v5345_v41, %v5344_v39  ;;  %s6246_s11 = smov 112   ;;  %v5355_v48 = vrot.slane %v5354_v18, 1 }
 0x2fb   : > { %5380 = vrot.lane.b32.xlu1 %v5339_v42, %s6241_s20 }
 0x2fc   : > { %v5356_v19 = vadd.f32 %v5355_v48, %v5354_v18 }
 0x2fe   : > { %5361 = vrot.lane.b32.xlu0 %v5332_v40, %s6242_s23 }
 0x2ff   : > { %5386 = vrot.lane.b32.xlu1 %v5346_v45, %s6243_s24 }
 0x302   : > { %5364 = vrot.lane.b32.xlu0 %v5332_v40, %s6244_s25 }
 0x303   : > { %5391 = vrot.lane.b32.xlu1 %v5346_v45, %s6220_s14  ;;  %s6250_s14 = smov 44  }
 0x306   : > { %5367 = vrot.lane.b32.xlu0 %v5332_v40, %s6222_s16  ;;  %s5839_s16 = sshll.u32 %s7052_s22, 3 }
 0x307   : > { %5394 = vrot.lane.b32.xlu1 %v5346_v45, %s6245_s27  ;;  %s273_s30 = scalar_lea.vmem %s7045_s1, %s5839_s16  ;;  %s278_s17 = scalar_lea.vmem %s7049_s5, %s5839_s16 }
 0x30a   : > { %5384 = vrot.lane.b32.xlu0 %v5339_v42, %s6243_s24 }
 0x30b   : > { %5397 = vrot.lane.b32.xlu1 %v5346_v45, %s6246_s11 }
 0x30e   : > { %5371 = vrot.lane.b32.xlu0 %v5339_v42, %s6247_s26 }
 0x30f   : > { %5400 = vrot.lane.b32.xlu1 %v5346_v45, %s6248_s28 }
 0x312   : > { %5374 = vrot.lane.b32.xlu0 %v5339_v42, %s6249_s29 }
 0x313   : > { %5404 = vrot.lane.b32.xlu1 %v5356_v19, %s6236_s15 }
 0x316   : > { %5377 = vrot.lane.b32.xlu0 %v5339_v42, %s6250_s14  ;;  %v5467_v42 = vld [vmem:[%s273_s30] sm:$0xff] }
 0x317   : > { %5407 = vrot.lane.b32.xlu1 %v5356_v19, %s6237_s19 }
 0x36c   : > { %v5359_v49 = vpop.permute.xlu0 %5358 }
 0x36d   : > { %v5381_v51 = vpop.permute.xlu1 %5380  ;;  %v5411_v10 = vsel %vm5410_vm7, %v5332_v40, %v5359_v49 }
 0x370   : > { %v5362_v52 = vpop.permute.xlu0 %5361 }
 0x371   : > { %v5387_v20 = vpop.permute.xlu1 %5386  ;;  %v5413_v63 = vsel %vm5412_vm8, %v5411_v10, %v5362_v52 }
 0x374   : > { %v5365_v53 = vpop.permute.xlu0 %5364 }
 0x375   : > { %v5392_v54 = vpop.permute.xlu1 %5391  ;;  %v5415_v16 = vsel %vm4844_vm4, %v5413_v63, %v5365_v53 }
 0x378   : > { %v5368_v55 = vpop.permute.xlu0 %5367 }
 0x379   : > { %v5395_v6 = vpop.permute.xlu1 %5394  ;;  %v5416_v4 = vsel %vm5347_vm1, %v5415_v16, %v5368_v55 }
 0x37c   : > { %v5385_v56 = vpop.permute.xlu0 %5384 }
 0x37d   : > { %v5389_v57 = vsel %vm5388_vm2, %v5385_v56, %v5387_v20  ;;  %v5398_v58 = vpop.permute.xlu1 %5397 }
 0x37e   : > { %v5423_v59 = vsel %vm5410_vm7, %v5381_v51, %v5389_v57 }
 0x37f   : > { %v5424_v60 = vsel %vm5412_vm8, %v5423_v59, %v5392_v54 }
 0x380   : > { %v5372_v1 = vpop.permute.xlu0 %5371  ;;  %v5425_v62 = vsel %vm4844_vm4, %v5424_v60, %v5395_v6 }
 0x381   : > { %v5401_v61 = vpop.permute.xlu1 %5400  ;;  %v5426_v8 = vsel %vm5347_vm1, %v5425_v62, %v5398_v58  ;;  %v5418_v7 = vsel %vm2281_vm15, %v5416_v4, %v5372_v1 }
 0x382   : > { %v5427_v9 = vsel %vm2281_vm15, %v5426_v8, %v5401_v61  ;;  %vm5464_vm15 = vcmp.lt.s32.totalorder %v300_v0, 256 }
 0x384   : > { %v5375_v2 = vpop.permute.xlu0 %5374 }
 0x385   : > { %v5405_v11 = vpop.permute.xlu1 %5404  ;;  %v5420_v22 = vsel %vm5419_vm9, %v5418_v7, %v5375_v2 }
 0x386   : > { %v5428_v12 = vsel %vm5419_vm9, %v5427_v9, %v5405_v11 }
 0x388   : > { %v5378_v14 = vpop.permute.xlu0 %5377 }
 0x389   : > { %v5422_v21 = vsel %vm5421_vm10, %v5420_v22, %v5378_v14  ;;  %v5408_v5 = vpop.permute.xlu1 %5407 }
 0x38a   : > { %v5835_v23 = vclamps-f32 %v5422_v21, 30.0  ;;  %v5429_v24 = vsel %vm5421_vm10, %v5428_v12, %v5408_v5 }
 0x38b   : > { %v5836_v13 = vclamps-f32 %v5429_v24, 30.0 }
 0x38c   : > { %v5434_v25 = vsub.f32 0.0, %v5835_v23 }
 0x38d   : > { %v5435_v26 = vsub.f32 0.0, %v5836_v13 }
 0x38e   : > { %v5436_v27 = vmul.f32 1.442695, %v5434_v25 }
 0x38f   : > { %v5438_v28 = vmul.f32 1.442695, %v5435_v26 }
 0x390   : > { %6191 = vpow2.f32 %v5436_v27 }
 0x391   : > { %6193 = vpow2.f32 %v5438_v28 }
 0x39a   : > { %v6192_v29 = vpop.eup %6191 }
 0x39b   : > { %v6194_v30 = vpop.eup %6193  ;;  %v5440_v31 = vadd.f32 1.0, %v6192_v29 }
 0x39c   : > { %v5441_v32 = vadd.f32 1.0, %v6194_v30 }
 0x39d   : > { %6195 = vrcp.f32 %v5440_v31 }
 0x39e   : > { %6197 = vrcp.f32 %v5441_v32 }
 0x3a7   : > { %v6196_v47 = vpop.eup %6195 }
 0x3a8   : > { %v6198_v38 = vpop.eup %6197  ;;  %v5468_v44 = vadd.f32 1.0, %v6196_v47 }
 0x3a9   : > { %v5446_v50 = vcombine.low %v6196_v47, %v6198_v38  ;;  %v5469_v39 = vadd.f32 1.0, %v6198_v38 }
 0x3aa   : > { %v5473_v17 = vrot.slane %v5468_v44, %v5472_v36 }
 0x3ab   : > { %v5453_v40 = vrot.slane %v5446_v50, %v5452_v37  ;;  %v5477_v41 = vrot.slane %v5469_v39, %v5472_v36 }
 0x3ad   : > { %v5460_v3 = vrot.slane %v5453_v40, %v5452_v37  ;;  %v5480_v43 = vcombine.low %v5473_v17, %v5477_v41 }
 0x3af   : > { %5466 = vst.msk [vmem:[%s282_s10] sm:$0x3] %vm5464_vm15, %v5460_v3  ;;  %v5482_v45 = vmul.f32 %v5480_v43, %v5467_v42 }
 0x3b1   : > { %5483 = vst [vmem:[%s278_s17] sm:$0xff] %v5482_v45 }
 0x3b2 PF: > { %s17_s21 = sadd.s32 1, %s6205_s21  }
 0x3b3   : > { %p14_p4 = scmp.ge.s32.totalorder %s17_s21, 4  }
 0x3b5   :  { %16 = sbr.rel (!%p14_p4) target bundleno = 1 (0x1), region = 117 }

</bundles_post_ra>
